<compile_context>
chip_gen: v7x
topology: tpu7x:2x2x1
jax: 0.10.0
libtpu: 0.0.40
codegen_flags: <defaults>
</compile_context>

<pallas_src>
import jax
import jax.numpy as jnp
from jax.experimental import pallas as pl
from jax.experimental.pallas import tpu as pltpu

HIDDEN = 300
HIDDEN_PAD = 384            # 300 padded up to a multiple of 128 lanes
PACKED = 2 * HIDDEN_PAD     # layer-1 output: [head1 | head2]


def _round_up(n, m):
    return ((n + m - 1) // m) * m


# --------------------------------------------------------------------------- #
# Kernel
# --------------------------------------------------------------------------- #
def _manager_critic_kernel(xu_ref,
                           w1_ref, b1_ref,
                           w2a_ref, b2a_ref,
                           w2b_ref, b2b_ref,
                           w3a_ref, w3b_ref, b3_ref,
                           q_ref):
    """Fused twin-Q forward for one (TB, S+G+A) batch tile.

    Layer 1: one packed dot producing (TB, 768) = [head1 | head2].
    Layer 2: two independent (384, 384) dots on lane-aligned slices of h.
    Layer 3: two (384, 2) dots (each head targets its own output column),
             summed into a single lane-dense (TB, 2) store.
    """
    cdt = w1_ref.dtype  # matmul / epilogue compute dtype (bf16 by default)

    # ---- layer 1: relu(concat(x,g,u) @ [W1 | W4] + [b1 | b4]) --------------
    h = jnp.dot(xu_ref[...].astype(cdt), w1_ref[...],
                preferred_element_type=jnp.float32)
    h = jnp.maximum(h.astype(cdt) + b1_ref[...], 0.0)          # epilogue in cdt

    # ---- layer 2: two independent 384x384 matmuls (lane-aligned slices) ----
    h1 = jnp.dot(h[:, :HIDDEN_PAD], w2a_ref[...],
                 preferred_element_type=jnp.float32)
    h1 = jnp.maximum(h1.astype(cdt) + b2a_ref[...], 0.0)
    h2 = jnp.dot(h[:, HIDDEN_PAD:], w2b_ref[...],
                 preferred_element_type=jnp.float32)
    h2 = jnp.maximum(h2.astype(cdt) + b2b_ref[...], 0.0)

    # ---- layer 3: per-head (384, 2) dots -> packed (TB, 2) [q1, q2] --------
    q = jnp.dot(h1, w3a_ref[...], preferred_element_type=jnp.float32)
    q = q + jnp.dot(h2, w3b_ref[...], preferred_element_type=jnp.float32)
    q_ref[...] = (q + b3_ref[...]).astype(q_ref.dtype)


# --------------------------------------------------------------------------- #
# Parameter construction / packing
# --------------------------------------------------------------------------- #
def init_manager_critic_params(key, state_dim, goal_dim, action_dim):
    """PyTorch-style per-layer (W^T, b) params, Linear default init."""
    in_dim = state_dim + goal_dim + action_dim
    layer_dims = [(in_dim, HIDDEN), (HIDDEN, HIDDEN), (HIDDEN, 1),   # l1,l2,l3
                  (in_dim, HIDDEN), (HIDDEN, HIDDEN), (HIDDEN, 1)]   # l4,l5,l6
    params = []
    keys = jax.random.split(key, 2 * len(layer_dims))
    for i, (fan_in, fan_out) in enumerate(layer_dims):
        bound = 1.0 / jnp.sqrt(jnp.float32(fan_in))
        w = jax.random.uniform(keys[2 * i], (fan_in, fan_out),
                               minval=-bound, maxval=bound, dtype=jnp.float32)
        b = jax.random.uniform(keys[2 * i + 1], (1, fan_out),
                               minval=-bound, maxval=bound, dtype=jnp.float32)
        params.append((w, b))
    return params


def pack_manager_critic_params(params, state_dim, goal_dim, action_dim,
                               compute_dtype=jnp.bfloat16):
    """Pack the 6 per-layer params into the fused/padded kernel layout."""
    (w1, b1), (w2, b2), (w3, b3), (w4, b4), (w5, b5), (w6, b6) = params
    in_dim = state_dim + goal_dim + action_dim
    H, HP, P = HIDDEN, HIDDEN_PAD, PACKED

    # layer 1 (+4): both heads side by side, zero-padded to lane multiples
    w1p = jnp.zeros((in_dim, P), jnp.float32)
    w1p = w1p.at[:, :H].set(w1).at[:, HP:HP + H].set(w4)
    b1p = jnp.zeros((1, P), jnp.float32)
    b1p = b1p.at[:, :H].set(b1.reshape(1, H)).at[:, HP:HP + H].set(b4.reshape(1, H))

    # layer 2 (+5): two separate (384, 384) weights (no block-diagonal padding)
    w2a = jnp.zeros((HP, HP), jnp.float32).at[:H, :H].set(w2)
    w2b = jnp.zeros((HP, HP), jnp.float32).at[:H, :H].set(w5)
    b2a = jnp.zeros((1, HP), jnp.float32).at[:, :H].set(b2.reshape(1, H))
    b2b = jnp.zeros((1, HP), jnp.float32).at[:, :H].set(b5.reshape(1, H))

    # layer 3 (+6): per-head (HP, 2) weights targeting their own output column,
    # scalar biases folded into a single (1, 2) f32 output bias.
    w3a = jnp.zeros((HP, 2), jnp.float32).at[:H, 0].set(w3.reshape(H))
    w3b = jnp.zeros((HP, 2), jnp.float32).at[:H, 1].set(w6.reshape(H))
    b3p = jnp.concatenate([b3.reshape(1, 1), b6.reshape(1, 1)], axis=1)

    cd = compute_dtype
    return (w1p.astype(cd), b1p.astype(cd),
            w2a.astype(cd), b2a.astype(cd),
            w2b.astype(cd), b2b.astype(cd),
            w3a.astype(cd), w3b.astype(cd),
            b3p.astype(jnp.float32))


# --------------------------------------------------------------------------- #
# Forward wrapper
# --------------------------------------------------------------------------- #
def manager_critic_forward(x, g, u, packed_params, *, batch_tile=512):
    """Equivalent of ManagerCritic.forward(x, g, u) -> (q1, q2)."""
    # Accept the caller's dtype; the compute-dtype cast happens in-kernel.
    xu = jnp.concatenate([x, g, u], axis=1)
    B, K = xu.shape
    (w1p, b1p, w2a, b2a, w2b, b2b, w3a, w3b, b3p) = packed_params

    # Batch tile: amortize per-grid-step overhead with large tiles, but keep
    # >= 2 grid steps when B allows so the "parallel" axis feeds both v7x TCs.
    if B > batch_tile:
        TB = batch_tile
    else:
        TB = max(8, min(_round_up(pl.cdiv(B, 2), 256), _round_up(B, 8)))
    nb = pl.cdiv(B, TB)

    def act_spec(d):
        return pl.BlockSpec((TB, d), lambda i: (i, 0))

    def resident_spec(w):  # weights/biases held resident across the batch grid
        return pl.BlockSpec(w.shape, lambda i: (0, 0))

    weights = (w1p, b1p, w2a, b2a, w2b, b2b, w3a, w3b, b3p)
    flops = 2 * B * (K * PACKED + 2 * HIDDEN_PAD * HIDDEN_PAD + 2 * HIDDEN_PAD * 2)
    bytes_accessed = int(xu.size * xu.dtype.itemsize
                         + sum(int(a.size) * a.dtype.itemsize for a in weights)
                         + B * 2 * 4)

    q = pl.pallas_call(
        _manager_critic_kernel,
        out_shape=jax.ShapeDtypeStruct((B, 2), jnp.float32),
        grid=(nb,),
        in_specs=[act_spec(K)] + [resident_spec(w) for w in weights],
        out_specs=pl.BlockSpec((TB, 2), lambda i: (i, 0)),
        compiler_params=pltpu.CompilerParams(
            dimension_semantics=("parallel",)),   # v7x: 2 TCs split the batch
        cost_estimate=pl.CostEstimate(flops=flops, transcendentals=0,
                                      bytes_accessed=bytes_accessed),
    )(xu, *weights)

    return q[:, 0:1], q[:, 1:2]


def manager_critic_reference(x, g, u, params):
    """Plain-JAX f32 reference matching the PyTorch module."""
    xu = jnp.concatenate([x, g, u], axis=1).astype(jnp.float32)
    (w1, b1), (w2, b2), (w3, b3), (w4, b4), (w5, b5), (w6, b6) = params

    def head(wa, ba, wb, bb, wc, bc):
        h = jnp.maximum(xu @ wa + ba, 0.0)
        h = jnp.maximum(h @ wb + bb, 0.0)
        return h @ wc + bc

    return head(w1, b1, w2, b2, w3, b3), head(w4, b4, w5, b5, w6, b6)


# --------------------------------------------------------------------------- #
if __name__ == "__main__":
    state_dim, goal_dim, action_dim = 12, 8, 4
    batch = 8

    key = jax.random.PRNGKey(0)
    kx, kg, ku, kp = jax.random.split(key, 4)

    x = jax.random.normal(kx, (batch, state_dim), dtype=jnp.float32)
    g = jax.random.normal(kg, (batch, goal_dim), dtype=jnp.float32)
    u = jax.random.normal(ku, (batch, action_dim), dtype=jnp.float32)

    params = init_manager_critic_params(kp, state_dim, goal_dim, action_dim)
    r1, r2 = manager_critic_reference(x, g, u, params)

    # --- f32 matmul path: tight check of the fused/packed kernel math -------
    packed_f32 = pack_manager_critic_params(params, state_dim, goal_dim,
                                            action_dim,
                                            compute_dtype=jnp.float32)
    q1_f32, q2_f32 = manager_critic_forward(x, g, u, packed_f32)
    q1_f32 = jax.block_until_ready(q1_f32)
    q2_f32 = jax.block_until_ready(q2_f32)
    assert q1_f32.shape == (batch, 1) and q2_f32.shape == (batch, 1)
    assert jnp.allclose(q1_f32, r1, atol=5e-3, rtol=5e-3)
    assert jnp.allclose(q2_f32, r2, atol=5e-3, rtol=5e-3)

    # --- default bf16 matmul + bf16 epilogue path (all generations) ---------
    packed_bf16 = pack_manager_critic_params(params, state_dim, goal_dim,
                                             action_dim,
                                             compute_dtype=jnp.bfloat16)
    q1, q2 = manager_critic_forward(x, g, u, packed_bf16)
    q1 = jax.block_until_ready(q1)
    q2 = jax.block_until_ready(q2)
    assert q1.shape == (batch, 1) and q2.shape == (batch, 1)
    assert jnp.allclose(q1, r1, atol=5e-2, rtol=5e-2)
    assert jnp.allclose(q2, r2, atol=5e-2, rtol=5e-2)

    print("KERNEL_OK")
</pallas_src>

<mosaic_0001>
module attributes {stable_mosaic.version = 11 : i64} {
  func.func @_manager_critic_kernel(%arg0: i32, %arg1: memref<8x24xf32, #tpu.memory_space<vmem>>, %arg2: memref<24x768xf32, #tpu.memory_space<vmem>>, %arg3: memref<1x768xf32, #tpu.memory_space<vmem>>, %arg4: memref<384x384xf32, #tpu.memory_space<vmem>>, %arg5: memref<1x384xf32, #tpu.memory_space<vmem>>, %arg6: memref<384x384xf32, #tpu.memory_space<vmem>>, %arg7: memref<1x384xf32, #tpu.memory_space<vmem>>, %arg8: memref<384x2xf32, #tpu.memory_space<vmem>>, %arg9: memref<384x2xf32, #tpu.memory_space<vmem>>, %arg10: memref<1x2xf32, #tpu.memory_space<vmem>>, %arg11: memref<8x2xf32, #tpu.memory_space<vmem>>) attributes {dimension_semantics = [#tpu.dimension_semantics<parallel>], iteration_bounds = array<i64: 1>, scalar_prefetch = 0 : i64, scratch_operands = 0 : i64, tpu.core_type = #tpu.core_type<tc>, window_params = [{transform_indices = @transform_0, window_bounds = array<i64: 8, 24>}, {pipeline_mode = #tpu.pipeline_mode<synchronous>, transform_indices = @transform_1, window_bounds = array<i64: 24, 768>}, {pipeline_mode = #tpu.pipeline_mode<synchronous>, transform_indices = @transform_2, window_bounds = array<i64: 1, 768>}, {pipeline_mode = #tpu.pipeline_mode<synchronous>, transform_indices = @transform_3, window_bounds = array<i64: 384, 384>}, {pipeline_mode = #tpu.pipeline_mode<synchronous>, transform_indices = @transform_4, window_bounds = array<i64: 1, 384>}, {pipeline_mode = #tpu.pipeline_mode<synchronous>, transform_indices = @transform_5, window_bounds = array<i64: 384, 384>}, {pipeline_mode = #tpu.pipeline_mode<synchronous>, transform_indices = @transform_6, window_bounds = array<i64: 1, 384>}, {pipeline_mode = #tpu.pipeline_mode<synchronous>, transform_indices = @transform_7, window_bounds = array<i64: 384, 2>}, {pipeline_mode = #tpu.pipeline_mode<synchronous>, transform_indices = @transform_8, window_bounds = array<i64: 384, 2>}, {pipeline_mode = #tpu.pipeline_mode<synchronous>, transform_indices = @transform_9, window_bounds = array<i64: 1, 2>}, {transform_indices = @transform_10, window_bounds = array<i64: 8, 2>}]} {
    %c0 = arith.constant 0 : index
    %c0_0 = arith.constant 0 : index
    %0 = vector.load %arg1[%c0, %c0_0] : memref<8x24xf32, #tpu.memory_space<vmem>>, vector<8x24xf32>
    %c0_1 = arith.constant 0 : index
    %c0_2 = arith.constant 0 : index
    %1 = vector.load %arg2[%c0_1, %c0_2] : memref<24x768xf32, #tpu.memory_space<vmem>>, vector<24x768xf32>
    %cst = arith.constant dense<0.000000e+00> : vector<8x768xf32>
    %2 = tpu.matmul %0, %1, %cst {dimension_numbers = #tpu.dot_dimension_numbers<[1], [0], [0], [1], [0, 0, 1, 1], [], []>} : vector<8x24xf32>, vector<24x768xf32>, vector<8x768xf32> -> vector<8x768xf32>
    %c0_3 = arith.constant 0 : index
    %c0_4 = arith.constant 0 : index
    %3 = vector.load %arg3[%c0_3, %c0_4] : memref<1x768xf32, #tpu.memory_space<vmem>>, vector<1x768xf32>
    %4 = vector.broadcast %3 : vector<1x768xf32> to vector<8x768xf32>
    %5 = arith.addf %2, %4 : vector<8x768xf32>
    %cst_5 = arith.constant 0.000000e+00 : f32
    %6 = vector.broadcast %cst_5 : f32 to vector<8x768xf32>
    %7 = arith.maximumf %5, %6 : vector<8x768xf32>
    %8 = vector.extract_strided_slice %7 {offsets = [0, 0], sizes = [8, 384], strides = [1, 1]} : vector<8x768xf32> to vector<8x384xf32>
    %c0_6 = arith.constant 0 : index
    %c0_7 = arith.constant 0 : index
    %9 = vector.load %arg4[%c0_6, %c0_7] : memref<384x384xf32, #tpu.memory_space<vmem>>, vector<384x384xf32>
    %cst_8 = arith.constant dense<0.000000e+00> : vector<8x384xf32>
    %10 = tpu.matmul %8, %9, %cst_8 {dimension_numbers = #tpu.dot_dimension_numbers<[1], [0], [0], [1], [0, 0, 1, 1], [], []>} : vector<8x384xf32>, vector<384x384xf32>, vector<8x384xf32> -> vector<8x384xf32>
    %c0_9 = arith.constant 0 : index
    %c0_10 = arith.constant 0 : index
    %11 = vector.load %arg5[%c0_9, %c0_10] : memref<1x384xf32, #tpu.memory_space<vmem>>, vector<1x384xf32>
    %12 = vector.broadcast %11 : vector<1x384xf32> to vector<8x384xf32>
    %13 = arith.addf %10, %12 : vector<8x384xf32>
    %cst_11 = arith.constant 0.000000e+00 : f32
    %14 = vector.broadcast %cst_11 : f32 to vector<8x384xf32>
    %15 = arith.maximumf %13, %14 : vector<8x384xf32>
    %16 = vector.extract_strided_slice %7 {offsets = [0, 384], sizes = [8, 384], strides = [1, 1]} : vector<8x768xf32> to vector<8x384xf32>
    %c0_12 = arith.constant 0 : index
    %c0_13 = arith.constant 0 : index
    %17 = vector.load %arg6[%c0_12, %c0_13] : memref<384x384xf32, #tpu.memory_space<vmem>>, vector<384x384xf32>
    %cst_14 = arith.constant dense<0.000000e+00> : vector<8x384xf32>
    %18 = tpu.matmul %16, %17, %cst_14 {dimension_numbers = #tpu.dot_dimension_numbers<[1], [0], [0], [1], [0, 0, 1, 1], [], []>} : vector<8x384xf32>, vector<384x384xf32>, vector<8x384xf32> -> vector<8x384xf32>
    %c0_15 = arith.constant 0 : index
    %c0_16 = arith.constant 0 : index
    %19 = vector.load %arg7[%c0_15, %c0_16] : memref<1x384xf32, #tpu.memory_space<vmem>>, vector<1x384xf32>
    %20 = vector.broadcast %19 : vector<1x384xf32> to vector<8x384xf32>
    %21 = arith.addf %18, %20 : vector<8x384xf32>
    %cst_17 = arith.constant 0.000000e+00 : f32
    %22 = vector.broadcast %cst_17 : f32 to vector<8x384xf32>
    %23 = arith.maximumf %21, %22 : vector<8x384xf32>
    %c0_18 = arith.constant 0 : index
    %c0_19 = arith.constant 0 : index
    %24 = vector.load %arg8[%c0_18, %c0_19] : memref<384x2xf32, #tpu.memory_space<vmem>>, vector<384x2xf32>
    %cst_20 = arith.constant dense<0.000000e+00> : vector<8x2xf32>
    %25 = tpu.matmul %15, %24, %cst_20 {dimension_numbers = #tpu.dot_dimension_numbers<[1], [0], [0], [1], [0, 0, 1, 1], [], []>} : vector<8x384xf32>, vector<384x2xf32>, vector<8x2xf32> -> vector<8x2xf32>
    %c0_21 = arith.constant 0 : index
    %c0_22 = arith.constant 0 : index
    %26 = vector.load %arg9[%c0_21, %c0_22] : memref<384x2xf32, #tpu.memory_space<vmem>>, vector<384x2xf32>
    %cst_23 = arith.constant dense<0.000000e+00> : vector<8x2xf32>
    %27 = tpu.matmul %23, %26, %cst_23 {dimension_numbers = #tpu.dot_dimension_numbers<[1], [0], [0], [1], [0, 0, 1, 1], [], []>} : vector<8x384xf32>, vector<384x2xf32>, vector<8x2xf32> -> vector<8x2xf32>
    %28 = arith.addf %25, %27 : vector<8x2xf32>
    %c0_24 = arith.constant 0 : index
    %c0_25 = arith.constant 0 : index
    %29 = vector.load %arg10[%c0_24, %c0_25] : memref<1x2xf32, #tpu.memory_space<vmem>>, vector<1x2xf32>
    %30 = vector.broadcast %29 : vector<1x2xf32> to vector<8x2xf32>
    %31 = arith.addf %28, %30 : vector<8x2xf32>
    %c0_26 = arith.constant 0 : index
    %c0_27 = arith.constant 0 : index
    %32 = vector.load %arg11[%c0_26, %c0_27] : memref<8x2xf32, #tpu.memory_space<vmem>>, vector<8x2xf32>
    tpu.vector_store %arg11[%c0_26, %c0_27], %31 {strides = array<i32>} : memref<8x2xf32, #tpu.memory_space<vmem>>, vector<8x2xf32>,
    return
  }
  func.func @transform_0(%arg0: i32) -> (i32, i32) {
    %c0_i32 = arith.constant 0 : i32
    %c0_i32_0 = arith.constant 0 : i32
    return %arg0, %c0_i32 : i32, i32
  }
  func.func @transform_1(%arg0: i32) -> (i32, i32) {
    %c0_i32 = arith.constant 0 : i32
    %c0_i32_0 = arith.constant 0 : i32
    %c0_i32_1 = arith.constant 0 : i32
    return %c0_i32, %c0_i32_0 : i32, i32
  }
  func.func @transform_2(%arg0: i32) -> (i32, i32) {
    %c0_i32 = arith.constant 0 : i32
    %c0_i32_0 = arith.constant 0 : i32
    %c0_i32_1 = arith.constant 0 : i32
    return %c0_i32, %c0_i32_0 : i32, i32
  }
  func.func @transform_3(%arg0: i32) -> (i32, i32) {
    %c0_i32 = arith.constant 0 : i32
    %c0_i32_0 = arith.constant 0 : i32
    %c0_i32_1 = arith.constant 0 : i32
    return %c0_i32, %c0_i32_0 : i32, i32
  }
  func.func @transform_4(%arg0: i32) -> (i32, i32) {
    %c0_i32 = arith.constant 0 : i32
    %c0_i32_0 = arith.constant 0 : i32
    %c0_i32_1 = arith.constant 0 : i32
    return %c0_i32, %c0_i32_0 : i32, i32
  }
  func.func @transform_5(%arg0: i32) -> (i32, i32) {
    %c0_i32 = arith.constant 0 : i32
    %c0_i32_0 = arith.constant 0 : i32
    %c0_i32_1 = arith.constant 0 : i32
    return %c0_i32, %c0_i32_0 : i32, i32
  }
  func.func @transform_6(%arg0: i32) -> (i32, i32) {
    %c0_i32 = arith.constant 0 : i32
    %c0_i32_0 = arith.constant 0 : i32
    %c0_i32_1 = arith.constant 0 : i32
    return %c0_i32, %c0_i32_0 : i32, i32
  }
  func.func @transform_7(%arg0: i32) -> (i32, i32) {
    %c0_i32 = arith.constant 0 : i32
    %c0_i32_0 = arith.constant 0 : i32
    %c0_i32_1 = arith.constant 0 : i32
    return %c0_i32, %c0_i32_0 : i32, i32
  }
  func.func @transform_8(%arg0: i32) -> (i32, i32) {
    %c0_i32 = arith.constant 0 : i32
    %c0_i32_0 = arith.constant 0 : i32
    %c0_i32_1 = arith.constant 0 : i32
    return %c0_i32, %c0_i32_0 : i32, i32
  }
  func.func @transform_9(%arg0: i32) -> (i32, i32) {
    %c0_i32 = arith.constant 0 : i32
    %c0_i32_0 = arith.constant 0 : i32
    %c0_i32_1 = arith.constant 0 : i32
    return %c0_i32, %c0_i32_0 : i32, i32
  }
  func.func @transform_10(%arg0: i32) -> (i32, i32) {
    %c0_i32 = arith.constant 0 : i32
    %c0_i32_0 = arith.constant 0 : i32
    return %arg0, %c0_i32 : i32, i32
  }
}

</mosaic_0001>

<bundles_post_ra>
// kernel: tpu_custom_call.1
= control target key start
LH: loop header
LB: loop body
LE: loop exit
PB: predicated region body
PF: predicated region fallthrough
CT: control target
= control target key end

     0   :  { %15 = vsyncpa [#allocation3], 0  ;;  %s3026_s0 = inlined_call_operand.vmem [shape: f32[8,24], index: 0, kind: input, shape index: {}]   ;;  %s3027_s1 = inlined_call_operand.vmem [shape: f32[24,768], index: 1, kind: input, shape index: {}]   ;;  %s3028_s2 = inlined_call_operand.vmem [shape: f32[1,768], index: 2, kind: input, shape index: {}]   ;;  %s3029_s3 = inlined_call_operand.hbm [shape: f32[384,384], index: 3, kind: input, shape index: {}]   ;;  %s3030_s4 = inlined_call_operand.vmem [shape: f32[1,384], index: 4, kind: input, shape index: {}]   ;;  %s3031_s5 = inlined_call_operand.hbm [shape: f32[384,384], index: 5, kind: input, shape index: {}]   ;;  %s3032_s6 = inlined_call_operand.vmem [shape: f32[1,384], index: 6, kind: input, shape index: {}]   ;;  %s3033_s7 = inlined_call_operand.vmem [shape: f32[384,2], index: 7, kind: input, shape index: {}]   ;;  %s3034_s8 = inlined_call_operand.vmem [shape: f32[384,2], index: 8, kind: input, shape index: {}]   ;;  %s3035_s9 = inlined_call_operand.vmem [shape: f32[1,2], index: 9, kind: input, shape index: {}]   ;;  %s3036_s10 = inlined_call_operand.vmem [shape: f32[8,2], index: 10, kind: output, shape index: {}]  }
   0x1   :  { %16 = vsyncpa [#allocation5], 0  ;;  %s2464_s13 = smov [#allocation2]   ;;  %s2416_s17 = scalar_lea.hbm %s3029_s3, 18432 }
   0x2   :  { %s28_s14 = sshll.u32 %s2464_s13, 4  ;;  %p2417_p0 = scmp.ne.s32.totalorder %s3029_s3, %s2416_s17  ;;  %s29_s14 = int_to_ptr.vmem [resolvable:$true] %s28_s14 }
   0x3   :  { %p2420_p1 = scmp.lt.u32.totalorder %s2416_s17, %s3029_s3 }
   0x5   :  { %p2422_p2 = pnand %p2420_p1, %p2417_p0 }
   0x7   :  { %2425 = shalt.err (!%p2422_p2)
}
   0x8   :  { %s2426_s22 = scalar_lea.vmem %s29_s14, 18432  ;;  %p2431_p4 = scmp.lt.s32.totalorder %s29_s14, %s29_s14 }
   0x9   :  { %p2427_p3 = scmp.ne.s32.totalorder %s29_s14, %s2426_s22  ;;  %p2432_p5 = scmp.lt.s32.totalorder %s2426_s22, %s2426_s22 }
   0xb   :  { %p2433_p6 = por %p2432_p5, %p2431_p4 }
   0xd   :  { %p2434_p7 = pnand %p2433_p6, %p2427_p3 }
   0xf   :  { %2437 = shalt.err (!%p2434_p7)
}
  0x10   :  { %s2465_s23 = smov 384   ;;  %s2466_s24 = smov 24  }
  0x11   :  { %34 = dma.hbm_to_vmem [thread:$0]  %s3029_s3, 18432, %s29_s14, [#allocation3], %s2465_s23, %s2465_s23, %s2466_s24  }
  0x12   :  { %s2467_s27 = smov [#allocation4]   ;;  %s2438_s11 = scalar_lea.hbm %s3031_s5, 18432 }
  0x13   :  { %s42_s28 = sshll.u32 %s2467_s27, 4  ;;  %p2439_p8 = scmp.ne.s32.totalorder %s3031_s5, %s2438_s11  ;;  %s43_s28 = int_to_ptr.vmem [resolvable:$true] %s42_s28 }
  0x14   :  { %p2442_p9 = scmp.lt.u32.totalorder %s2438_s11, %s3031_s5 }
  0x16   :  { %p2444_p10 = pnand %p2442_p9, %p2439_p8 }
  0x18   :  { %2447 = shalt.err (!%p2444_p10)
}
  0x19   :  { %s2448_s17 = scalar_lea.vmem %s43_s28, 18432  ;;  %p2453_p12 = scmp.lt.s32.totalorder %s43_s28, %s43_s28 }
  0x1a   :  { %p2449_p11 = scmp.ne.s32.totalorder %s43_s28, %s2448_s17  ;;  %p2454_p13 = scmp.lt.s32.totalorder %s2448_s17, %s2448_s17 }
  0x1c   :  { %p2455_p0 = por %p2454_p13, %p2453_p12 }
  0x1e   :  { %p2456_p1 = pnand %p2455_p0, %p2449_p11 }
  0x20   :  { %2459 = shalt.err (!%p2456_p1)
}
  0x21   :  { %48 = dma.hbm_to_vmem [thread:$0]  %s3031_s5, 18432, %s43_s28, [#allocation5], %s2465_s23, %s2465_s23, %s2466_s24  }
  0x22   :  { %2460 = dma.done.wait [#allocation3], 18432  }
  0x23   :  { %2461 = vsyncadd [#allocation3], 4294948864 }
  0x24   :  { %2462 = dma.done.wait [#allocation5], 18432  }
  0x25   :  { %2463 = vsyncadd [#allocation5], 4294948864  ;;  %v2468_v0 = vmov 0.0   ;;  %v65_v1 = vld [vmem:[%s3027_s1 + $0x8] sm:$0xff]  ;;  %v71_v2 = vld [vmem:[%s3027_s1 + $0x38] sm:$0xff]  ;;  %vm114_vm0 = vcmask 195584  }
  0x26   :  { %182 = vmatprep.mubr.f32.mxu0 %v2468_v0  ;;  %253 = vmatprep.mubr.f32.mxu1 %v2468_v0  ;;  %v64_v3 = vld [vmem:[%s3027_s1] sm:$0xff]  ;;  %v1973_v4 = vpack.c.bf16 %v71_v2, %v65_v1  ;;  %v70_v5 = vld [vmem:[%s3027_s1 + $0x30] sm:$0xff]  ;;  %v77_v7 = vld [vmem:[%s3027_s1 + $0x68] sm:$0xff]  ;;  %vm2470_vm1 = vmmov 0   ;;  %vm1613_vm2 = vcmask 15360  }
  0x27   :  { %v1975_v6 = vpack.c.bf16 %v70_v5, %v64_v3  ;;  %v67_v8 = vld [vmem:[%s3027_s1 + $0x18] sm:$0xff]  ;;  %v73_v9 = vld [vmem:[%s3027_s1 + $0x48] sm:$0xff]  ;;  %v76_v10 = vld [vmem:[%s3027_s1 + $0x60] sm:$0xff] }
  0x28   :  { %1974 = vmatprep.subr.bf16.mxu0 %v1973_v4  ;;  %v1977_v11 = vpack.c.bf16 %v73_v9, %v67_v8  ;;  %v66_v12 = vld [vmem:[%s3027_s1 + $0x10] sm:$0xff]  ;;  %v72_v13 = vld [vmem:[%s3027_s1 + $0x40] sm:$0xff]  ;;  %v79_v15 = vld [vmem:[%s3027_s1 + $0x78] sm:$0xff] }
  0x29   :  { %1976 = vmatpush1.bf16.msra.mxu0 %v1975_v6  ;;  %v1979_v14 = vpack.c.bf16 %v72_v13, %v66_v12  ;;  %v69_v16 = vld [vmem:[%s3027_s1 + $0x28] sm:$0xff]  ;;  %v75_v17 = vld [vmem:[%s3027_s1 + $0x58] sm:$0xff]  ;;  %v63_v18 = vld [vmem:[%s3026_s0] sm:$0xff] }
  0x2a   :  { %122 = vmatprep.subr.mxu0 %v77_v7  ;;  %1978 = vmatprep.subr.bf16.mxu1 %v1977_v11  ;;  %v1981_v19 = vpack.c.bf16 %v75_v17, %v69_v16  ;;  %v68_v20 = vld [vmem:[%s3027_s1 + $0x20] sm:$0xff]  ;;  %v74_v21 = vld [vmem:[%s3027_s1 + $0x50] sm:$0xff]  ;;  %v338_v24 = vld [vmem:[#allocation2 + $0x8] sm:$0xff] }
  0x2b   :  { %1980 = vmatpush1.bf16.msra.mxu1 %v1979_v14  ;;  %v78_v22 = vld [vmem:[%s3027_s1 + $0x70] sm:$0xff]  ;;  %v1983_v23 = vpack.c.bf16 %v74_v21, %v68_v20  ;;  %v341_v25 = vld [vmem:[#allocation2 + $0x20] sm:$0xff]  ;;  %v340_v27 = vld [vmem:[#allocation2 + $0x18] sm:$0xff] }
  0x2c   :  { %193 = vmatprep.subr.mxu1 %v79_v15  ;;  %v337_v26 = vld [vmem:[#allocation2] sm:$0xff]  ;;  %v344_v28 = vld [vmem:[#allocation2 + $0x38] sm:$0xff]  ;;  %v81_v29 = vld [vmem:[%s3027_s1 + $0x88] sm:$0xff]  ;;  %v1985_v30 = vpack.c.bf16 %v341_v25, %v338_v24 }
  0x2d   :  { %123 = vmatpush1.msra.mxu0 %v76_v10  ;;  %v347_v31 = vld [vmem:[#allocation2 + $0x50] sm:$0xff]  ;;  %v1987_v32 = vpack.c.bf16 %v340_v27, %v337_v26  ;;  %v346_v35 = vld [vmem:[#allocation2 + $0x48] sm:$0xff]  ;;  %v80_v36 = vld [vmem:[%s3027_s1 + $0x80] sm:$0xff] }
  0x2e   :  { %1621 = vmatmul.mubr.msk.f32.vlgmr.msra.gmra.mrb[0].mxu0 %vm114_vm0, %v63_v18  ;;  %1982 = vmatprep.subr.bf16.mxu0 %v1981_v19  ;;  %v1989_v33 = vpack.c.bf16 %v347_v31, %v344_v28  ;;  %v343_v34 = vld [vmem:[#allocation2 + $0x30] sm:$0xff]  ;;  %v350_v37 = vld [vmem:[#allocation2 + $0x68] sm:$0xff]  ;;  %v353_v38 = vld [vmem:[#allocation2 + $0x80] sm:$0xff] }
  0x2f   :  { %194 = vmatpush1.msra.mxu1 %v78_v22  ;;  %1984 = vmatpush1.bf16.msra.mxu0 %v1983_v23  ;;  %v1991_v39 = vpack.c.bf16 %v346_v35, %v343_v34  ;;  %v1993_v40 = vpack.c.bf16 %v353_v38, %v350_v37  ;;  %v349_v41 = vld [vmem:[#allocation2 + $0x60] sm:$0xff]  ;;  %v352_v42 = vld [vmem:[#allocation2 + $0x78] sm:$0xff]  ;;  %v359_v44 = vld [vmem:[#allocation2 + $0xb0] sm:$0xff] }
  0x30   :  { %1622 = vmatmul.mubr.msk.f32.vlgmr.msra.gmra.mrb[0].mxu1 %vm114_vm0, %v63_v18  ;;  %264 = vmatprep.subr.mxu0 %v81_v29  ;;  %v356_v43 = vld [vmem:[#allocation2 + $0x98] sm:$0xff]  ;;  %v1995_v45 = vpack.c.bf16 %v352_v42, %v349_v41  ;;  %v355_v46 = vld [vmem:[#allocation2 + $0x90] sm:$0xff]  ;;  %v358_v49 = vld [vmem:[#allocation2 + $0xa8] sm:$0xff] }
  0x31   :  { %324 = vmatprep.mubr.f32.mxu0 %v2468_v0  ;;  %1986 = vmatprep.subr.bf16.mxu1 %v1985_v30  ;;  %v387_v47 = vld [vmem:[#allocation2 + $0x190] sm:$0xff]  ;;  %v1997_v48 = vpack.c.bf16 %v359_v44, %v356_v43  ;;  %v362_v50 = vld [vmem:[#allocation2 + $0xc8] sm:$0xff]  ;;  %v365_v52 = vld [vmem:[#allocation2 + $0xe0] sm:$0xff]  ;;  %v1999_v59 = vpack.c.bf16 %v358_v49, %v355_v46 }
  0x32   :  { %1988 = vmatpush1.bf16.msra.mxu1 %v1987_v32  ;;  %v390_v51 = vld [vmem:[#allocation2 + $0x1a8] sm:$0xff]  ;;  %v339_v54 = vld [vmem:[#allocation2 + $0x10] sm:$0xff]  ;;  %v393_v57 = vld [vmem:[#allocation2 + $0x1c0] sm:$0xff]  ;;  %v2001_v63 = vpack.c.bf16 %v365_v52, %v362_v50 }
  0x33   :  { %265 = vmatpush1.msra.mxu0 %v80_v36  ;;  %1990 = vmatprep.subr.bf16.mxu1 %v1989_v33  ;;  %v2081_v53 = vpack.c.bf16 %v390_v51, %v387_v47  ;;  %v342_v55 = vld [vmem:[#allocation2 + $0x28] sm:$0xff]  ;;  %v396_v58 = vld [vmem:[#allocation2 + $0x1d8] sm:$0xff]  ;;  %v361_v60 = vld [vmem:[#allocation2 + $0xc0] sm:$0xff] }
  0x34   :  { %1623 = vmatmul.mubr.msk.f32.vlgmr.msra.gmra.mrb[2].mxu0 %vm114_vm0, %v63_v18  ;;  %v2083_v56 = vpack.c.bf16 %v342_v55, %v339_v54  ;;  %v2085_v61 = vpack.c.bf16 %v396_v58, %v393_v57  ;;  %v345_v62 = vld [vmem:[#allocation2 + $0x40] sm:$0xff]  ;;  %v364_v1 = vld [vmem:[#allocation2 + $0xd8] sm:$0xff]  ;;  %v371_v4 = vld [vmem:[#allocation2 + $0x110] sm:$0xff] }
  0x35   :  { %2082 = vmatprep.subr.bf16.mxu0 %v2081_v53  ;;  %v368_v2 = vld [vmem:[#allocation2 + $0xf8] sm:$0xff]  ;;  %v399_v6 = vld [vmem:[#allocation2 + $0x1f0] sm:$0xff]  ;;  %v402_v7 = vld [vmem:[#allocation2 + $0x208] sm:$0xff]  ;;  %v2003_v11 = vpack.c.bf16 %v364_v1, %v361_v60 }
  0x36   :  { %1992 = vmatpush1.bf16.msra.mxu1 %v1991_v39  ;;  %2084 = vmatpush3.bf16.msra.mxu0 %v2083_v56  ;;  %v348_v3 = vld [vmem:[#allocation2 + $0x58] sm:$0xff]  ;;  %v2089_v8 = vpack.c.bf16 %v402_v7, %v399_v6  ;;  %v351_v9 = vld [vmem:[#allocation2 + $0x70] sm:$0xff]  ;;  %v354_v10 = vld [vmem:[#allocation2 + $0x88] sm:$0xff]  ;;  %v2005_v14 = vpack.c.bf16 %v371_v4, %v368_v2 }
  0x37   :  { %1994 = vmatprep.subr.bf16.mxu1 %v1993_v40  ;;  %2086 = vmatprep.subr.bf16.mxu0 %v2085_v61  ;;  %v2087_v5 = vpack.c.bf16 %v348_v3, %v345_v62  ;;  %v367_v12 = vld [vmem:[#allocation2 + $0xf0] sm:$0xff]  ;;  %v405_v13 = vld [vmem:[#allocation2 + $0x220] sm:$0xff]  ;;  %v370_v15 = vld [vmem:[#allocation2 + $0x108] sm:$0xff]  ;;  %v2091_v17 = vpack.c.bf16 %v354_v10, %v351_v9 }
  0x38   :  { %v374_v16 = vld [vmem:[#allocation2 + $0x128] sm:$0xff]  ;;  %v408_v18 = vld [vmem:[#allocation2 + $0x238] sm:$0xff]  ;;  %v377_v19 = vld [vmem:[#allocation2 + $0x140] sm:$0xff]  ;;  %v2007_v25 = vpack.c.bf16 %v370_v15, %v367_v12 }
  0x39   :  { %v2093_v20 = vpack.c.bf16 %v408_v18, %v405_v13  ;;  %v357_v21 = vld [vmem:[#allocation2 + $0xa0] sm:$0xff]  ;;  %v360_v22 = vld [vmem:[#allocation2 + $0xb8] sm:$0xff]  ;;  %v411_v23 = vld [vmem:[#allocation2 + $0x250] sm:$0xff]  ;;  %v2009_v26 = vpack.c.bf16 %v377_v19, %v374_v16 }
  0x3a   :  { %1996 = vmatpush1.bf16.msra.mxu1 %v1995_v45  ;;  %2088 = vmatpush3.bf16.msra.mxu0 %v2087_v5  ;;  %v414_v24 = vld [vmem:[#allocation2 + $0x268] sm:$0xff]  ;;  %v373_v27 = vld [vmem:[#allocation2 + $0x120] sm:$0xff]  ;;  %v376_v28 = vld [vmem:[#allocation2 + $0x138] sm:$0xff]  ;;  %v2095_v30 = vpack.c.bf16 %v360_v22, %v357_v21 }
  0x3b   :  { %1998 = vmatprep.subr.bf16.mxu1 %v1997_v48  ;;  %2090 = vmatprep.subr.bf16.mxu0 %v2089_v8  ;;  %v380_v29 = vld [vmem:[#allocation2 + $0x158] sm:$0xff]  ;;  %v383_v31 = vld [vmem:[#allocation2 + $0x170] sm:$0xff]  ;;  %v2097_v32 = vpack.c.bf16 %v414_v24, %v411_v23  ;;  %v366_v34 = vld [vmem:[#allocation2 + $0xe8] sm:$0xff]  ;;  %v2011_v37 = vpack.c.bf16 %v376_v28, %v373_v27 }
  0x3c   :  { %v363_v33 = vld [vmem:[#allocation2 + $0xd0] sm:$0xff]  ;;  %v417_v35 = vld [vmem:[#allocation2 + $0x280] sm:$0xff]  ;;  %v420_v36 = vld [vmem:[#allocation2 + $0x298] sm:$0xff]  ;;  %v2013_v38 = vpack.c.bf16 %v383_v31, %v380_v29 }
  0x3d   :  { %v379_v39 = vld [vmem:[#allocation2 + $0x150] sm:$0xff]  ;;  %v382_v40 = vld [vmem:[#allocation2 + $0x168] sm:$0xff]  ;;  %v2099_v42 = vpack.c.bf16 %v366_v34, %v363_v33  ;;  %v389_v43 = vld [vmem:[#allocation2 + $0x1a0] sm:$0xff]  ;;  %v2101_v44 = vpack.c.bf16 %v420_v36, %v417_v35 }
  0x3e   :  { %2000 = vmatpush1.bf16.msra.mxu1 %v1999_v59  ;;  %2092 = vmatpush3.bf16.msra.mxu0 %v2091_v17  ;;  %v386_v41 = vld [vmem:[#allocation2 + $0x188] sm:$0xff]  ;;  %v369_v45 = vld [vmem:[#allocation2 + $0x100] sm:$0xff]  ;;  %v372_v46 = vld [vmem:[#allocation2 + $0x118] sm:$0xff]  ;;  %v2015_v49 = vpack.c.bf16 %v382_v40, %v379_v39 }
  0x3f   :  { %2002 = vmatprep.subr.bf16.mxu1 %v2001_v63  ;;  %2094 = vmatprep.subr.bf16.mxu0 %v2093_v20  ;;  %v423_v47 = vld [vmem:[#allocation2 + $0x2b0] sm:$0xff]  ;;  %v426_v48 = vld [vmem:[#allocation2 + $0x2c8] sm:$0xff]  ;;  %v2017_v50 = vpack.c.bf16 %v389_v43, %v386_v41  ;;  %v385_v51 = vld [vmem:[#allocation2 + $0x180] sm:$0xff]  ;;  %v2103_v54 = vpack.c.bf16 %v372_v46, %v369_v45 }
  0x40   :  { %v388_v52 = vld [vmem:[#allocation2 + $0x198] sm:$0xff]  ;;  %v395_v55 = vld [vmem:[#allocation2 + $0x1d0] sm:$0xff]  ;;  %v2105_v56 = vpack.c.bf16 %v426_v48, %v423_v47  ;;  %v378_v58 = vld [vmem:[#allocation2 + $0x148] sm:$0xff]  ;;  %v2469_v47 = vmov 0.0|0.0   ;;  %v84_v48 = vlaneseq }
  0x41   :  { %v392_v53 = vld [vmem:[#allocation2 + $0x1b8] sm:$0xff]  ;;  %v375_v57 = vld [vmem:[#allocation2 + $0x130] sm:$0xff]  ;;  %v2019_v59 = vpack.c.bf16 %v388_v52, %v385_v51  ;;  %v394_v62 = vld [vmem:[#allocation2 + $0x1c8] sm:$0xff] }
  0x42   :  { %2004 = vmatpush1.bf16.msra.mxu1 %v2003_v11  ;;  %2096 = vmatpush3.bf16.msra.mxu0 %v2095_v30  ;;  %v2021_v60 = vpack.c.bf16 %v395_v55, %v392_v53  ;;  %v391_v61 = vld [vmem:[#allocation2 + $0x1b0] sm:$0xff]  ;;  %v2107_v63 = vpack.c.bf16 %v378_v58, %v375_v57  ;;  %v398_v1 = vld [vmem:[#allocation2 + $0x1e8] sm:$0xff]  ;;  %v401_v2 = vld [vmem:[#allocation2 + $0x200] sm:$0xff] }
  0x43   :  { %2006 = vmatprep.subr.bf16.mxu1 %v2005_v14  ;;  %2098 = vmatprep.subr.bf16.mxu0 %v2097_v32  ;;  %v2023_v3 = vpack.c.bf16 %v394_v62, %v391_v61  ;;  %v2025_v4 = vpack.c.bf16 %v401_v2, %v398_v1  ;;  %v397_v5 = vld [vmem:[#allocation2 + $0x1e0] sm:$0xff]  ;;  %v400_v6 = vld [vmem:[#allocation2 + $0x1f8] sm:$0xff]  ;;  %v407_v8 = vld [vmem:[#allocation2 + $0x230] sm:$0xff] }
  0x44   :  { %v404_v7 = vld [vmem:[#allocation2 + $0x218] sm:$0xff]  ;;  %v2027_v9 = vpack.c.bf16 %v400_v6, %v397_v5  ;;  %v403_v11 = vld [vmem:[#allocation2 + $0x210] sm:$0xff]  ;;  %v406_v12 = vld [vmem:[#allocation2 + $0x228] sm:$0xff] }
  0x45   :  { %v2029_v10 = vpack.c.bf16 %v407_v8, %v404_v7  ;;  %v410_v13 = vld [vmem:[#allocation2 + $0x248] sm:$0xff]  ;;  %v413_v14 = vld [vmem:[#allocation2 + $0x260] sm:$0xff]  ;;  %v2031_v15 = vpack.c.bf16 %v406_v12, %v403_v11  ;;  %v412_v18 = vld [vmem:[#allocation2 + $0x258] sm:$0xff] }
  0x46   :  { %2008 = vmatpush1.bf16.msra.mxu1 %v2007_v25  ;;  %2100 = vmatpush3.bf16.msra.mxu0 %v2099_v42  ;;  %v2033_v16 = vpack.c.bf16 %v413_v14, %v410_v13  ;;  %v409_v17 = vld [vmem:[#allocation2 + $0x240] sm:$0xff]  ;;  %v416_v19 = vld [vmem:[#allocation2 + $0x278] sm:$0xff]  ;;  %v419_v20 = vld [vmem:[#allocation2 + $0x290] sm:$0xff] }
  0x47   :  { %2010 = vmatprep.subr.bf16.mxu1 %v2009_v26  ;;  %2102 = vmatprep.subr.bf16.mxu0 %v2101_v44  ;;  %v2035_v21 = vpack.c.bf16 %v412_v18, %v409_v17  ;;  %v2037_v22 = vpack.c.bf16 %v419_v20, %v416_v19  ;;  %v415_v23 = vld [vmem:[#allocation2 + $0x270] sm:$0xff]  ;;  %v418_v24 = vld [vmem:[#allocation2 + $0x288] sm:$0xff]  ;;  %v425_v26 = vld [vmem:[#allocation2 + $0x2c0] sm:$0xff] }
  0x48   :  { %v422_v25 = vld [vmem:[#allocation2 + $0x2a8] sm:$0xff]  ;;  %v2039_v27 = vpack.c.bf16 %v418_v24, %v415_v23  ;;  %v421_v29 = vld [vmem:[#allocation2 + $0x2a0] sm:$0xff]  ;;  %v424_v30 = vld [vmem:[#allocation2 + $0x2b8] sm:$0xff] }
  0x49   :  { %v2041_v28 = vpack.c.bf16 %v425_v26, %v422_v25  ;;  %v2043_v31 = vpack.c.bf16 %v424_v30, %v421_v29  ;;  %v428_v32 = vld [vmem:[#allocation2 + $0x2d8] sm:$0xff]  ;;  %v431_v33 = vld [vmem:[#allocation2 + $0x2f0] sm:$0xff]  ;;  %v429_v34 = vld [vmem:[#allocation2 + $0x2e0] sm:$0xff] }
  0x4a   :  { %2012 = vmatpush1.bf16.msra.mxu1 %v2011_v37  ;;  %2104 = vmatpush3.bf16.msra.mxu0 %v2103_v54  ;;  %v2045_v35 = vpack.c.bf16 %v431_v33, %v428_v32  ;;  %v432_v36 = vld [vmem:[#allocation2 + $0x2f8] sm:$0xff]  ;;  %v427_v37 = vld [vmem:[#allocation2 + $0x2d0] sm:$0xff]  ;;  %v381_v41 = vld [vmem:[#allocation2 + $0x160] sm:$0xff] }
  0x4b   :  { %2014 = vmatprep.subr.bf16.mxu1 %v2013_v38  ;;  %2106 = vmatprep.subr.bf16.mxu0 %v2105_v56  ;;  %v430_v38 = vld [vmem:[#allocation2 + $0x2e8] sm:$0xff]  ;;  %v2109_v39 = vpack.c.bf16 %v432_v36, %v429_v34  ;;  %v384_v42 = vld [vmem:[#allocation2 + $0x178] sm:$0xff]  ;;  %v437_v45 = vld [vmem:[#allocation2 + $0x320] sm:$0xff] }
  0x4c   :  { %v2047_v40 = vpack.c.bf16 %v430_v38, %v427_v37  ;;  %v2111_v43 = vpack.c.bf16 %v384_v42, %v381_v41  ;;  %v434_v44 = vld [vmem:[#allocation2 + $0x308] sm:$0xff]  ;;  %v2622_v51 = vld [vmem:[%s3028_s2] sm:$0x3f]  ;;  %v443_v1 = vld [vmem:[#allocation2 + $0x350] sm:$0xff] }
  0x4d   :  { %v2049_v46 = vpack.c.bf16 %v437_v45, %v434_v44  ;;  %v433_v56 = vld [vmem:[#allocation2 + $0x300] sm:$0xff]  ;;  %v438_v61 = vld [vmem:[#allocation2 + $0x328] sm:$0xff]  ;;  %v439_v7 = vld [vmem:[#allocation2 + $0x330] sm:$0xff] }
  0x4e   :  { %2016 = vmatpush1.bf16.msra.mxu1 %v2015_v49  ;;  %2108 = vmatpush3.bf16.msra.mxu0 %v2107_v63  ;;  %v2614_v49 = vshrl.u32 %v84_v48, 7  ;;  %v440_v63 = vld [vmem:[#allocation2 + $0x338] sm:$0xff]  ;;  %v441_v11 = vld [vmem:[#allocation2 + $0x340] sm:$0xff]  ;;  %v446_v13 = vld [vmem:[#allocation2 + $0x368] sm:$0xff] }
  0x4f   :  { %2018 = vmatprep.subr.bf16.mxu1 %v2017_v50  ;;  %2110 = vmatprep.subr.bf16.mxu0 %v2109_v39  ;;  %v444_v12 = vld [vmem:[#allocation2 + $0x358] sm:$0xff]  ;;  %v449_v14 = vld [vmem:[#allocation2 + $0x380] sm:$0xff]  ;;  %v450_v23 = vld [vmem:[#allocation2 + $0x388] sm:$0xff] }
  0x50   :  { %v2617_v50 = vsub.s32 0, %v2614_v49  ;;  %v2625_v52 = vsub.s32 1, %v2614_v49  ;;  %v2117_v18 = vpack.c.bf16 %v444_v12, %v441_v11  ;;  %v445_v19 = vld [vmem:[#allocation2 + $0x360] sm:$0xff]  ;;  %v2057_v20 = vpack.c.bf16 %v449_v14, %v446_v13  ;;  %v452_v24 = vld [vmem:[#allocation2 + $0x398] sm:$0xff]  ;;  %v455_v25 = vld [vmem:[#allocation2 + $0x3b0] sm:$0xff] }
  0x51   :  { %v2061_v29 = vpack.c.bf16 %v455_v25, %v452_v24  ;;  %v454_v30 = vld [vmem:[#allocation2 + $0x3a8] sm:$0xff]  ;;  %v456_v32 = vld [vmem:[#allocation2 + $0x3b8] sm:$0xff]  ;;  %v461_v34 = vld [vmem:[#allocation2 + $0x3e0] sm:$0xff] }
  0x52   :  { %2020 = vmatpush1.bf16.msra.mxu1 %v2019_v59  ;;  %2112 = vmatpush3.bf16.msra.mxu0 %v2111_v43  ;;  %v87_v53 = vrot.slane %v2622_v51, %v2617_v50  ;;  %v91_v54 = vrot.slane %v2622_v51, %v2625_v52  ;;  %v436_v59 = vld [vmem:[#allocation2 + $0x318] sm:$0xff]  ;;  %v458_v33 = vld [vmem:[#allocation2 + $0x3c8] sm:$0xff]  ;;  %v457_v37 = vld [vmem:[#allocation2 + $0x3c0] sm:$0xff] }
  0x53   :  { %2022 = vmatprep.subr.bf16.mxu1 %v2021_v60  ;;  %2113 = vmatprep.subr.bf16.mxu0 %v2469_v47  ;;  %v435_v60 = vld [vmem:[#allocation2 + $0x310] sm:$0xff]  ;;  %v2051_v5 = vpack.c.bf16 %v436_v59, %v433_v56  ;;  %v2065_v38 = vpack.c.bf16 %v461_v34, %v458_v33  ;;  %v460_v39 = vld [vmem:[#allocation2 + $0x3d8] sm:$0xff]  ;;  %v462_v41 = vld [vmem:[#allocation2 + $0x3e8] sm:$0xff] }
  0x54   :  { %v2114_v6 = vpack.c.bf16 %v438_v61, %v435_v60  ;;  %v464_v42 = vld [vmem:[#allocation2 + $0x3f8] sm:$0xff]  ;;  %v467_v43 = vld [vmem:[#allocation2 + $0x410] sm:$0xff]  ;;  %v2067_v44 = vpack.c.bf16 %v460_v39, %v457_v37  ;;  %v470_v56 = vld [vmem:[#allocation2 + $0x428] sm:$0xff] }
  0x55   :  { %v2069_v48 = vpack.c.bf16 %v467_v43, %v464_v42  ;;  %v469_v61 = vld [vmem:[#allocation2 + $0x420] sm:$0xff]  ;;  %v475_v11 = vld [vmem:[#allocation2 + $0x450] sm:$0xff]  ;;  %v478_v12 = vld [vmem:[#allocation2 + $0x468] sm:$0xff] }
  0x56   :  { %2024 = vmatpush1.bf16.msra.mxu1 %v2023_v3  ;;  %v477_v14 = vld [vmem:[#allocation2 + $0x460] sm:$0xff]  ;;  %v2079_v24 = vpack.c.bf16 %v478_v12, %v475_v11  ;;  %v793_v33 = vld [vmem:[#allocation4 + $0x50] sm:$0xff] }
  0x57   :  { %2026 = vmatprep.subr.bf16.mxu1 %v2025_v4  ;;  %v839_v34 = vld [vmem:[#allocation4 + $0x1c0] sm:$0xff]  ;;  %v789_v39 = vld [vmem:[#allocation4 + $0x30] sm:$0xff] }
  0x58   :  { %v791_v43 = vld [vmem:[#allocation4 + $0x40] sm:$0xff] }
  0x59   :  { %v803_v12 = vld [vmem:[#allocation4 + $0xa0] sm:$0xff] }
  0x5a   :  { %2028 = vmatpush1.bf16.msra.mxu1 %v2027_v9  ;;  %v2053_v9 = vpack.c.bf16 %v443_v1, %v440_v63  ;;  %v472_v63 = vld [vmem:[#allocation2 + $0x438] sm:$0xff]  ;;  %v471_v1 = vld [vmem:[#allocation2 + $0x430] sm:$0xff] }
  0x5b   :  { %2030 = vmatprep.subr.bf16.mxu1 %v2029_v10  ;;  %v442_v10 = vld [vmem:[#allocation2 + $0x348] sm:$0xff] }
  0x5c   :  { %v2055_v17 = vpack.c.bf16 %v442_v10, %v439_v7  ;;  %v102_v7 = vsub.s32 4, %v2614_v49 }
  0x5e   :  { %2032 = vmatpush1.bf16.msra.mxu1 %v2031_v15 }
  0x5f   :  { %2034 = vmatprep.subr.bf16.mxu1 %v2033_v16 }
  0x62   :  { %2036 = vmatpush1.bf16.msra.mxu1 %v2035_v21  ;;  %v448_v21 = vld [vmem:[#allocation2 + $0x378] sm:$0xff] }
  0x63   :  { %2038 = vmatprep.subr.bf16.mxu1 %v2037_v22  ;;  %v447_v22 = vld [vmem:[#allocation2 + $0x370] sm:$0xff]  ;;  %v2059_v26 = vpack.c.bf16 %v448_v21, %v445_v19  ;;  %v787_v19 = vld [vmem:[#allocation4 + $0x20] sm:$0xff]  ;;  %v836_v21 = vld [vmem:[#allocation4 + $0x1a8] sm:$0xff] }
  0x66   :  { %2040 = vmatpush1.bf16.msra.mxu1 %v2039_v27  ;;  %v2120_v27 = vpack.c.bf16 %v450_v23, %v447_v22  ;;  %v103_v22 = vrot.slane %v2622_v51, %v102_v7 }
  0x67   :  { %2042 = vmatprep.subr.bf16.mxu1 %v2041_v28  ;;  %v451_v28 = vld [vmem:[#allocation2 + $0x390] sm:$0xff] }
  0x6a   :  { %2044 = vmatpush1.bf16.msra.mxu1 %v2043_v31  ;;  %v453_v31 = vld [vmem:[#allocation2 + $0x3a0] sm:$0xff] }
  0x6b   :  { %2046 = vmatprep.subr.bf16.mxu1 %v2045_v35  ;;  %v2063_v35 = vpack.c.bf16 %v454_v30, %v451_v28  ;;  %v2123_v36 = vpack.c.bf16 %v456_v32, %v453_v31  ;;  %v785_v30 = vld [vmem:[#allocation4 + $0x10] sm:$0xff]  ;;  %v788_v31 = vld [vmem:[#allocation4 + $0x28] sm:$0xff]  ;;  %v790_v32 = vld [vmem:[#allocation4 + $0x38] sm:$0xff] }
  0x6e   :  { %2048 = vmatpush1.bf16.msra.mxu1 %v2047_v40  ;;  %v459_v40 = vld [vmem:[#allocation2 + $0x3d0] sm:$0xff] }
  0x6f   :  { %2050 = vmatprep.subr.bf16.mxu1 %v2049_v46  ;;  %v2126_v45 = vpack.c.bf16 %v462_v41, %v459_v40  ;;  %v463_v46 = vld [vmem:[#allocation2 + $0x3f0] sm:$0xff]  ;;  %v792_v40 = vld [vmem:[#allocation4 + $0x48] sm:$0xff]  ;;  %v2141_v41 = vpack.c.bf16 %v793_v33, %v790_v32 }
 0x101   :  { %v184_v55 = vpop.f32.mrb[0].mxu0 }
 0x102   :  { %v185_v57 = vadd.f32 %v184_v55, %v87_v53  ;;  %v186_v58 = vpop.f32.mrb[1].mxu0  ;;  %v466_v53 = vld [vmem:[#allocation2 + $0x408] sm:$0xff]  ;;  %v468_v55 = vld [vmem:[#allocation2 + $0x418] sm:$0xff] }
 0x103   :  { %v187_v62 = vadd.f32 %v186_v58, %v91_v54  ;;  %v2631_v2 = vpop.f32.mrb[0].mxu1  ;;  %v465_v54 = vld [vmem:[#allocation2 + $0x400] sm:$0xff]  ;;  %v2647_v58 = vsub.s32 2, %v2614_v49  ;;  %v2071_v59 = vpack.c.bf16 %v466_v53, %v463_v46  ;;  %v848_v53 = vld [vmem:[#allocation4 + $0x208] sm:$0xff] }
 0x104   :  { %v2633_v3 = vpop.f32.mrb[1].mxu1  ;;  %v331_v8 = vmax.f32 %v185_v57, 0.0  ;;  %v473_v57 = vld [vmem:[#allocation2 + $0x440] sm:$0xff]  ;;  %v2129_v60 = vpack.c.bf16 %v468_v55, %v465_v54 }
 0x105   :  { %v332_v4 = vmax.f32 %v187_v62, 0.0  ;;  %v2073_v62 = vpack.c.bf16 %v473_v57, %v470_v56  ;;  %v799_v46 = vld [vmem:[#allocation4 + $0x80] sm:$0xff]  ;;  %v798_v57 = vld [vmem:[#allocation4 + $0x78] sm:$0xff] }
 0x106   :  { %v795_v56 = vld [vmem:[#allocation4 + $0x60] sm:$0xff] }
 0x107   :  { %562 = vmatprep.mubr.f32.mxu1 %v332_v4  ;;  %704 = vmatprep.mubr.f32.mxu0 %v332_v4  ;;  %v2635_v15 = vpop.f32.mrb[2].mxu0  ;;  %v474_v4 = vld [vmem:[#allocation2 + $0x448] sm:$0xff] }
 0x108   :  { %563 = vmatmul.mubr.f32.vlgmr.msra.gmra.mrb[2].mxu1 %v331_v8  ;;  %705 = vmatmul.mubr.f32.vlgmr.msra.gmra.mrb[4].mxu0 %v331_v8  ;;  %v2637_v16 = vpop.f32.mrb[3].mxu0  ;;  %v95_v8 = vrot.slane %v2622_v51, %v2647_v58  ;;  %v2132_v10 = vpack.c.bf16 %v474_v4, %v471_v1  ;;  %v805_v1 = vld [vmem:[#allocation4 + $0xb0] sm:$0xff]  ;;  %v851_v4 = vld [vmem:[#allocation4 + $0x220] sm:$0xff] }
 0x109   :  { %2052 = vmatpush1.bf16.msra.mxu1 %v2051_v5  ;;  %2115 = vmatpush3.bf16.msra.mxu0 %v2114_v6  ;;  %v476_v5 = vld [vmem:[#allocation2 + $0x458] sm:$0xff]  ;;  %v479_v6 = vld [vmem:[#allocation2 + $0x470] sm:$0xff] }
 0x10a   :  { %2054 = vmatprep.subr.bf16.mxu1 %v2053_v9  ;;  %2116 = vmatprep.subr.bf16.mxu0 %v2469_v47  ;;  %v2075_v9 = vpack.c.bf16 %v472_v63, %v469_v61  ;;  %v2077_v13 = vpack.c.bf16 %v479_v6, %v476_v5  ;;  %v256_v23 = vadd.f32 %v2631_v2, %v95_v8  ;;  %v797_v61 = vld [vmem:[#allocation4 + $0x70] sm:$0xff]  ;;  %v802_v63 = vld [vmem:[#allocation4 + $0x98] sm:$0xff] }
 0x10b   :  { %633 = vmatprep.mubr.f32.mxu1 %v2468_v0  ;;  %1865 = vmatprep.mubr.msk.f32.mxu0 %vm2470_vm1, %v2468_v0  ;;  %v854_v5 = vld [vmem:[#allocation4 + $0x238] sm:$0xff]  ;;  %v2147_v6 = vpack.c.bf16 %v798_v57, %v795_v56  ;;  %v801_v8 = vld [vmem:[#allocation4 + $0x90] sm:$0xff] }
 0x10c   :  { %v333_v2 = vmax.f32 %v256_v23, 0.0  ;;  %v2245_v11 = vpack.c.bf16 %v854_v5, %v851_v4  ;;  %v810_v23 = vld [vmem:[#allocation4 + $0xd8] sm:$0xff]  ;;  %v829_v57 = vld [vmem:[#allocation4 + $0x170] sm:$0xff] }
 0x10d   :  { %2056 = vmatpush1.bf16.msra.mxu1 %v2055_v17  ;;  %2118 = vmatpush3.bf16.msra.mxu0 %v2117_v18  ;;  %v480_v17 = vld [vmem:[#allocation2 + $0x478] sm:$0xff]  ;;  %v784_v18 = vld [vmem:[#allocation4 + $0x8] sm:$0xff] }
 0x10e   :  { %2058 = vmatprep.subr.bf16.mxu1 %v2057_v20  ;;  %2119 = vmatprep.subr.bf16.mxu0 %v2469_v47  ;;  %v833_v20 = vld [vmem:[#allocation4 + $0x190] sm:$0xff]  ;;  %v2135_v25 = vpack.c.bf16 %v480_v17, %v477_v14  ;;  %v2137_v28 = vpack.c.bf16 %v787_v19, %v784_v18  ;;  %v808_v14 = vld [vmem:[#allocation4 + $0xc8] sm:$0xff]  ;;  %v811_v17 = vld [vmem:[#allocation4 + $0xe0] sm:$0xff] }
 0x10f   :  { %v857_v18 = vld [vmem:[#allocation4 + $0x250] sm:$0xff]  ;;  %v860_v19 = vld [vmem:[#allocation4 + $0x268] sm:$0xff]  ;;  %v826_v56 = vld [vmem:[#allocation4 + $0x158] sm:$0xff] }
 0x110   :  { %v2165_v4 = vpack.c.bf16 %v829_v57, %v826_v56  ;;  %v858_v57 = vld [vmem:[#allocation4 + $0x258] sm:$0xff] }
 0x111   :  { %2060 = vmatpush1.bf16.msra.mxu1 %v2059_v26  ;;  %2121 = vmatpush3.bf16.msra.mxu0 %v2120_v27  ;;  %v783_v26 = vld [vmem:[#allocation4] sm:$0xff]  ;;  %v786_v27 = vld [vmem:[#allocation4 + $0x18] sm:$0xff] }
 0x112   :  { %2062 = vmatprep.subr.bf16.mxu1 %v2061_v29  ;;  %2122 = vmatprep.subr.bf16.mxu0 %v2469_v47  ;;  %v2233_v29 = vpack.c.bf16 %v836_v21, %v833_v20  ;;  %v2139_v37 = vpack.c.bf16 %v786_v27, %v783_v26  ;;  %v809_v26 = vld [vmem:[#allocation4 + $0xd0] sm:$0xff]  ;;  %v812_v27 = vld [vmem:[#allocation4 + $0xe8] sm:$0xff] }
 0x113   :  { %v2251_v33 = vpack.c.bf16 %v812_v27, %v809_v26  ;;  %v840_v27 = vld [vmem:[#allocation4 + $0x1c8] sm:$0xff] }
 0x115   :  { %2064 = vmatpush1.bf16.msra.mxu1 %v2063_v35  ;;  %2124 = vmatpush3.bf16.msra.mxu0 %v2123_v36  ;;  %v842_v35 = vld [vmem:[#allocation4 + $0x1d8] sm:$0xff]  ;;  %v327_v36 = vadd.f32 %v2635_v15, %v103_v22  ;;  %v2143_v15 = vpack.c.bf16 %v792_v40, %v789_v39  ;;  %v807_v22 = vld [vmem:[#allocation4 + $0xc0] sm:$0xff]  ;;  %v820_v39 = vld [vmem:[#allocation4 + $0x128] sm:$0xff] }
 0x116   :  { %2066 = vmatprep.subr.bf16.mxu1 %v2065_v38  ;;  %2125 = vmatprep.subr.bf16.mxu0 %v2469_v47  ;;  %v2235_v38 = vpack.c.bf16 %v788_v31, %v785_v30  ;;  %v2237_v42 = vpack.c.bf16 %v842_v35, %v839_v34  ;;  %v863_v30 = vld [vmem:[#allocation4 + $0x280] sm:$0xff]  ;;  %v866_v31 = vld [vmem:[#allocation4 + $0x298] sm:$0xff]  ;;  %v2155_v32 = vpack.c.bf16 %v810_v23, %v807_v22  ;;  %v813_v34 = vld [vmem:[#allocation4 + $0xf0] sm:$0xff] }
 0x117   :  { %v335_v54 = vmax.f32 %v327_v36, 0.0  ;;  %v816_v35 = vld [vmem:[#allocation4 + $0x108] sm:$0xff]  ;;  %v823_v40 = vld [vmem:[#allocation4 + $0x140] sm:$0xff]  ;;  %v841_v22 = vld [vmem:[#allocation4 + $0x1d0] sm:$0xff] }
 0x119   :  { %2068 = vmatpush1.bf16.msra.mxu1 %v2067_v44  ;;  %2127 = vmatpush3.bf16.msra.mxu0 %v2126_v45  ;;  %v794_v44 = vld [vmem:[#allocation4 + $0x58] sm:$0xff]  ;;  %v796_v45 = vld [vmem:[#allocation4 + $0x68] sm:$0xff] }
 0x11a   :  { %2070 = vmatprep.subr.bf16.mxu1 %v2069_v48  ;;  %2128 = vmatprep.subr.bf16.mxu0 %v2469_v47  ;;  %v845_v48 = vld [vmem:[#allocation4 + $0x1f0] sm:$0xff]  ;;  %v2239_v55 = vpack.c.bf16 %v794_v44, %v791_v43  ;;  %v2159_v43 = vpack.c.bf16 %v816_v35, %v813_v34  ;;  %v843_v34 = vld [vmem:[#allocation4 + $0x1e0] sm:$0xff] }
 0x11d   :  { %2072 = vmatpush1.bf16.msra.mxu1 %v2071_v59  ;;  %2130 = vmatpush3.bf16.msra.mxu0 %v2129_v60  ;;  %v2145_v59 = vpack.c.bf16 %v799_v46, %v796_v45  ;;  %v2241_v60 = vpack.c.bf16 %v848_v53, %v845_v48  ;;  %v819_v45 = vld [vmem:[#allocation4 + $0x120] sm:$0xff]  ;;  %v822_v46 = vld [vmem:[#allocation4 + $0x138] sm:$0xff]  ;;  %v98_v48 = vsub.s32 3, %v2614_v49  ;;  %v2161_v53 = vpack.c.bf16 %v823_v40, %v820_v39  ;;  %v853_v39 = vld [vmem:[#allocation4 + $0x230] sm:$0xff] }
 0x11e   :  { %2074 = vmatprep.subr.bf16.mxu1 %v2073_v62  ;;  %2131 = vmatprep.subr.bf16.mxu0 %v2469_v47  ;;  %v800_v62 = vld [vmem:[#allocation4 + $0x88] sm:$0xff] }
 0x11f   :  { %v2243_v7 = vpack.c.bf16 %v800_v62, %v797_v61  ;;  %v2163_v61 = vpack.c.bf16 %v822_v46, %v819_v45  ;;  %v899_v45 = vld [vmem:[#allocation4 + $0x3a0] sm:$0xff]  ;;  %v902_v46 = vld [vmem:[#allocation4 + $0x3b8] sm:$0xff] }
 0x121   :  { %2076 = vmatpush1.bf16.msra.mxu1 %v2075_v9  ;;  %2133 = vmatpush3.bf16.msra.mxu0 %v2132_v10  ;;  %v804_v9 = vld [vmem:[#allocation4 + $0xa8] sm:$0xff]  ;;  %v2149_v10 = vpack.c.bf16 %v805_v1, %v802_v63  ;;  %v825_v63 = vld [vmem:[#allocation4 + $0x150] sm:$0xff]  ;;  %v99_v1 = vrot.slane %v2622_v51, %v98_v48 }
 0x122   :  { %2078 = vmatprep.subr.bf16.mxu1 %v2077_v13  ;;  %2134 = vmatprep.subr.bf16.mxu0 %v2469_v47  ;;  %v806_v13 = vld [vmem:[#allocation4 + $0xb8] sm:$0xff]  ;;  %v2151_v20 = vpack.c.bf16 %v804_v9, %v801_v8  ;;  %v832_v9 = vld [vmem:[#allocation4 + $0x188] sm:$0xff] }
 0x123   :  { %v2247_v21 = vpack.c.bf16 %v806_v13, %v803_v12  ;;  %v830_v8 = vld [vmem:[#allocation4 + $0x178] sm:$0xff]  ;;  %v831_v13 = vld [vmem:[#allocation4 + $0x180] sm:$0xff]  ;;  %v856_v48 = vld [vmem:[#allocation4 + $0x248] sm:$0xff] }
 0x125   :  { %2080 = vmatpush1.bf16.msra.mxu1 %v2079_v24  ;;  %2136 = vmatpush3.bf16.msra.mxu0 %v2135_v25  ;;  %v2153_v24 = vpack.c.bf16 %v811_v17, %v808_v14  ;;  %v2249_v25 = vpack.c.bf16 %v860_v19, %v857_v18  ;;  %v2661_v14 = vadd.f32 %v2633_v3, %v99_v1  ;;  %v834_v18 = vld [vmem:[#allocation4 + $0x198] sm:$0xff]  ;;  %v881_v19 = vld [vmem:[#allocation4 + $0x310] sm:$0xff] }
 0x126   :  { %2138 = vmatprep.subr.bf16.mxu0 %v2137_v28  ;;  %2234 = vmatprep.subr.bf16.mxu1 %v2233_v29  ;;  %v814_v28 = vld [vmem:[#allocation4 + $0xf8] sm:$0xff]  ;;  %v817_v29 = vld [vmem:[#allocation4 + $0x110] sm:$0xff]  ;;  %v2171_v23 = vpack.c.bf16 %v834_v18, %v831_v13 }
 0x127   :  { %v2157_v36 = vpack.c.bf16 %v817_v29, %v814_v28  ;;  %v334_v26 = vmax.f32 %v2661_v14, 0.0  ;;  %v887_v28 = vld [vmem:[#allocation4 + $0x340] sm:$0xff]  ;;  %v890_v29 = vld [vmem:[#allocation4 + $0x358] sm:$0xff]  ;;  %v900_v14 = vld [vmem:[#allocation4 + $0x3a8] sm:$0xff] }
 0x128   :  { %634 = vmatmul.mubr.f32.vlgmr.msra.gmra.mrb[2].mxu1 %v333_v2  ;;  %1866 = vmatmul.mubr.f32.vlgmr.msra.gmra.mrb[6].mxu0 %v333_v2  ;;  %v2253_v2 = vpack.c.bf16 %v866_v31, %v863_v30  ;;  %v844_v30 = vld [vmem:[#allocation4 + $0x1e8] sm:$0xff]  ;;  %v847_v31 = vld [vmem:[#allocation4 + $0x200] sm:$0xff] }
 0x129   :  { %2140 = vmatpush1.bf16.msra.mxu0 %v2139_v37  ;;  %2236 = vmatpush3.bf16.msra.mxu1 %v2235_v38  ;;  %v815_v37 = vld [vmem:[#allocation4 + $0x100] sm:$0xff]  ;;  %v818_v38 = vld [vmem:[#allocation4 + $0x118] sm:$0xff]  ;;  %v2177_v35 = vpack.c.bf16 %v847_v31, %v844_v30  ;;  %v880_v31 = vld [vmem:[#allocation4 + $0x308] sm:$0xff] }
 0x12a   :  { %2142 = vmatprep.subr.bf16.mxu0 %v2141_v41  ;;  %2238 = vmatprep.subr.bf16.mxu1 %v2237_v42  ;;  %v869_v41 = vld [vmem:[#allocation4 + $0x2b0] sm:$0xff]  ;;  %v872_v42 = vld [vmem:[#allocation4 + $0x2c8] sm:$0xff]  ;;  %v2255_v44 = vpack.c.bf16 %v818_v38, %v815_v37  ;;  %v850_v38 = vld [vmem:[#allocation4 + $0x218] sm:$0xff] }
 0x12b   :  { %1150 = vmatprep.mubr.f32.mxu1 %v335_v54  ;;  %1008 = vmatprep.mubr.f32.mxu0 %v335_v54  ;;  %v2257_v54 = vpack.c.bf16 %v872_v42, %v869_v41  ;;  %v896_v37 = vld [vmem:[#allocation4 + $0x388] sm:$0xff]  ;;  %v849_v42 = vld [vmem:[#allocation4 + $0x210] sm:$0xff]  ;;  %v926_v30 = vld [vmem:[#allocation4 + $0x478] sm:$0xff] }
 0x12d   :  { %2144 = vmatpush1.bf16.msra.mxu0 %v2143_v15  ;;  %2240 = vmatpush3.bf16.msra.mxu1 %v2239_v55  ;;  %v821_v15 = vld [vmem:[#allocation4 + $0x130] sm:$0xff]  ;;  %v824_v55 = vld [vmem:[#allocation4 + $0x148] sm:$0xff] }
 0x12e   :  { %2146 = vmatprep.subr.bf16.mxu0 %v2145_v59  ;;  %2242 = vmatprep.subr.bf16.mxu1 %v2241_v60  ;;  %v875_v59 = vld [vmem:[#allocation4 + $0x2e0] sm:$0xff]  ;;  %v878_v60 = vld [vmem:[#allocation4 + $0x2f8] sm:$0xff]  ;;  %v2259_v62 = vpack.c.bf16 %v824_v55, %v821_v15  ;;  %v2275_v15 = vpack.c.bf16 %v902_v46, %v899_v45 }
 0x12f   :  { %v2261_v5 = vpack.c.bf16 %v878_v60, %v875_v59  ;;  %v855_v55 = vld [vmem:[#allocation4 + $0x240] sm:$0xff]  ;;  %v905_v59 = vld [vmem:[#allocation4 + $0x3d0] sm:$0xff]  ;;  %v908_v60 = vld [vmem:[#allocation4 + $0x3e8] sm:$0xff] }
 0x130   :  { %v2278_v1 = vpack.c.bf16 %v908_v60, %v905_v59  ;;  %v907_v59 = vld [vmem:[#allocation4 + $0x3e0] sm:$0xff] }
 0x131   :  { %2148 = vmatpush1.bf16.msra.mxu0 %v2147_v6  ;;  %2244 = vmatpush3.bf16.msra.mxu1 %v2243_v7  ;;  %v828_v6 = vld [vmem:[#allocation4 + $0x168] sm:$0xff]  ;;  %v827_v7 = vld [vmem:[#allocation4 + $0x160] sm:$0xff] }
 0x132   :  { %2150 = vmatprep.subr.bf16.mxu0 %v2149_v10  ;;  %2246 = vmatprep.subr.bf16.mxu1 %v2245_v11  ;;  %v835_v10 = vld [vmem:[#allocation4 + $0x1a0] sm:$0xff]  ;;  %v2167_v11 = vpack.c.bf16 %v828_v6, %v825_v63  ;;  %v2263_v12 = vpack.c.bf16 %v830_v8, %v827_v7  ;;  %v2187_v63 = vpack.c.bf16 %v858_v57, %v855_v55  ;;  %v864_v6 = vld [vmem:[#allocation4 + $0x288] sm:$0xff]  ;;  %v914_v8 = vld [vmem:[#allocation4 + $0x418] sm:$0xff] }
 0x133   :  { %v2169_v17 = vpack.c.bf16 %v835_v10, %v832_v9  ;;  %v911_v7 = vld [vmem:[#allocation4 + $0x400] sm:$0xff]  ;;  %v868_v9 = vld [vmem:[#allocation4 + $0x2a8] sm:$0xff]  ;;  %v897_v57 = vld [vmem:[#allocation4 + $0x390] sm:$0xff] }
 0x134   :  { %v871_v10 = vld [vmem:[#allocation4 + $0x2c0] sm:$0xff]  ;;  %v2281_v13 = vpack.c.bf16 %v914_v8, %v911_v7  ;;  %v2215_v60 = vpack.c.bf16 %v900_v14, %v897_v57  ;;  %v909_v7 = vld [vmem:[#allocation4 + $0x3f0] sm:$0xff]  ;;  %v912_v8 = vld [vmem:[#allocation4 + $0x408] sm:$0xff] }
 0x135   :  { %2152 = vmatpush1.bf16.msra.mxu0 %v2151_v20  ;;  %2248 = vmatpush3.bf16.msra.mxu1 %v2247_v21  ;;  %v884_v20 = vld [vmem:[#allocation4 + $0x328] sm:$0xff]  ;;  %v838_v21 = vld [vmem:[#allocation4 + $0x1b8] sm:$0xff]  ;;  %v2193_v18 = vpack.c.bf16 %v871_v10, %v868_v9  ;;  %v919_v10 = vld [vmem:[#allocation4 + $0x440] sm:$0xff] }
 0x136   :  { %2154 = vmatprep.subr.bf16.mxu0 %v2153_v24  ;;  %2250 = vmatprep.subr.bf16.mxu1 %v2249_v25  ;;  %v2266_v24 = vpack.c.bf16 %v884_v20, %v881_v19  ;;  %v837_v25 = vld [vmem:[#allocation4 + $0x1b0] sm:$0xff]  ;;  %v2173_v3 = vpack.c.bf16 %v841_v22, %v838_v21  ;;  %v870_v19 = vld [vmem:[#allocation4 + $0x2b8] sm:$0xff]  ;;  %v920_v21 = vld [vmem:[#allocation4 + $0x448] sm:$0xff] }
 0x137   :  { %v917_v20 = vld [vmem:[#allocation4 + $0x430] sm:$0xff]  ;;  %v874_v22 = vld [vmem:[#allocation4 + $0x2d8] sm:$0xff]  ;;  %v916_v9 = vld [vmem:[#allocation4 + $0x428] sm:$0xff] }
 0x138   :  { %v1279_v14 = vld [vmem:[%s3034_s8 + $0x10] sm:$0xff] }
 0x139   :  { %2156 = vmatpush1.bf16.msra.mxu0 %v2155_v32  ;;  %2252 = vmatpush3.bf16.msra.mxu1 %v2251_v33  ;;  %v2175_v32 = vpack.c.bf16 %v840_v27, %v837_v25  ;;  %v2269_v33 = vpack.c.bf16 %v890_v29, %v887_v28  ;;  %v876_v28 = vld [vmem:[#allocation4 + $0x2e8] sm:$0xff]  ;;  %v923_v29 = vld [vmem:[#allocation4 + $0x460] sm:$0xff] }
 0x13a   :  { %2158 = vmatprep.subr.bf16.mxu0 %v2157_v36  ;;  %2254 = vmatprep.subr.bf16.mxu1 %v2253_v2  ;;  %v846_v36 = vld [vmem:[#allocation4 + $0x1f8] sm:$0xff]  ;;  %v893_v2 = vld [vmem:[#allocation4 + $0x370] sm:$0xff] }
 0x13b   :  { %v2179_v40 = vpack.c.bf16 %v846_v36, %v843_v34  ;;  %v2272_v41 = vpack.c.bf16 %v896_v37, %v893_v2  ;;  %v2287_v34 = vpack.c.bf16 %v926_v30, %v923_v29  ;;  %v879_v36 = vld [vmem:[#allocation4 + $0x300] sm:$0xff]  ;;  %v882_v2 = vld [vmem:[#allocation4 + $0x318] sm:$0xff] }
 0x13c   :  { %v886_v37 = vld [vmem:[#allocation4 + $0x338] sm:$0xff]  ;;  %v1313_v30 = vld [vmem:[%s3034_s8 + $0x120] sm:$0xff] }
 0x13d   :  { %2160 = vmatpush1.bf16.msra.mxu0 %v2159_v43  ;;  %2256 = vmatpush3.bf16.msra.mxu1 %v2255_v44  ;;  %v2181_v43 = vpack.c.bf16 %v853_v39, %v850_v38  ;;  %v852_v44 = vld [vmem:[#allocation4 + $0x228] sm:$0xff]  ;;  %v889_v38 = vld [vmem:[#allocation4 + $0x350] sm:$0xff] }
 0x13e   :  { %2162 = vmatprep.subr.bf16.mxu0 %v2161_v53  ;;  %2258 = vmatprep.subr.bf16.mxu1 %v2257_v54  ;;  %v859_v53 = vld [vmem:[#allocation4 + $0x260] sm:$0xff]  ;;  %v2183_v54 = vpack.c.bf16 %v852_v44, %v849_v42  ;;  %v888_v42 = vld [vmem:[#allocation4 + $0x348] sm:$0xff] }
 0x13f   :  { %v2185_v56 = vpack.c.bf16 %v859_v53, %v856_v48  ;;  %v895_v44 = vld [vmem:[#allocation4 + $0x380] sm:$0xff]  ;;  %v894_v53 = vld [vmem:[#allocation4 + $0x378] sm:$0xff] }
 0x140   :  { %v891_v48 = vld [vmem:[#allocation4 + $0x360] sm:$0xff] }
 0x141   :  { %2164 = vmatpush1.bf16.msra.mxu0 %v2163_v61  ;;  %2260 = vmatpush3.bf16.msra.mxu1 %v2259_v62  ;;  %v862_v61 = vld [vmem:[#allocation4 + $0x278] sm:$0xff]  ;;  %v865_v62 = vld [vmem:[#allocation4 + $0x290] sm:$0xff]  ;;  %v2211_v55 = vpack.c.bf16 %v894_v53, %v891_v48  ;;  %v1277_v53 = vld [vmem:[%s3034_s8] sm:$0xff] }
 0x142   :  { %2166 = vmatprep.subr.bf16.mxu0 %v2165_v4  ;;  %2262 = vmatprep.subr.bf16.mxu1 %v2261_v5  ;;  %v861_v4 = vld [vmem:[#allocation4 + $0x270] sm:$0xff]  ;;  %v2189_v5 = vpack.c.bf16 %v865_v62, %v862_v61  ;;  %v903_v62 = vld [vmem:[#allocation4 + $0x3c0] sm:$0xff] }
 0x145   :  { %2168 = vmatpush1.bf16.msra.mxu0 %v2167_v11  ;;  %2264 = vmatpush3.bf16.msra.mxu1 %v2263_v12  ;;  %v106_v11 = vsub.s32 5, %v2614_v49  ;;  %v2191_v12 = vpack.c.bf16 %v864_v6, %v861_v4  ;;  %v2284_v49 = vpack.c.bf16 %v920_v21, %v917_v20  ;;  %v913_v4 = vld [vmem:[#allocation4 + $0x410] sm:$0xff] }
 0x146   :  { %2170 = vmatprep.subr.bf16.mxu0 %v2169_v17  ;;  %2265 = vmatprep.subr.bf16.mxu1 %v2469_v47  ;;  %v867_v17 = vld [vmem:[#allocation4 + $0x2a0] sm:$0xff] }
 0x147   :  { %v2195_v25 = vpack.c.bf16 %v870_v19, %v867_v17  ;;  %v918_v17 = vld [vmem:[#allocation4 + $0x438] sm:$0xff]  ;;  %v925_v19 = vld [vmem:[#allocation4 + $0x470] sm:$0xff] }
 0x148   :  { %1151 = vmatmul.mubr.f32.vlgmr.msra.gmra.mrb[4].mxu1 %v334_v26 }
 0x149   :  { %2172 = vmatpush1.bf16.msra.mxu0 %v2171_v23  ;;  %2267 = vmatpush3.bf16.msra.mxu1 %v2266_v24  ;;  %v877_v23 = vld [vmem:[#allocation4 + $0x2f0] sm:$0xff]  ;;  %v107_v24 = vrot.slane %v2622_v51, %v106_v11  ;;  %v2223_v11 = vpack.c.bf16 %v912_v8, %v909_v7 }
 0x14a   :  { %2174 = vmatprep.subr.bf16.mxu0 %v2173_v3  ;;  %2268 = vmatprep.subr.bf16.mxu1 %v2469_v47  ;;  %v873_v3 = vld [vmem:[#allocation4 + $0x2d0] sm:$0xff]  ;;  %v2197_v27 = vpack.c.bf16 %v877_v23, %v874_v22  ;;  %v924_v23 = vld [vmem:[#allocation4 + $0x468] sm:$0xff] }
 0x14b   :  { %1900 = vmatprep.mubr.msk.f32.mxu1 %vm2470_vm1, %v2468_v0  ;;  %v2199_v51 = vpack.c.bf16 %v876_v28, %v873_v3  ;;  %v921_v22 = vld [vmem:[#allocation4 + $0x450] sm:$0xff]  ;;  %v1312_v28 = vld [vmem:[%s3034_s8 + $0x118] sm:$0xff] }
 0x14c   :  { %v1311_v3 = vld [vmem:[%s3034_s8 + $0x110] sm:$0xff] }
 0x14d   :  { %2176 = vmatpush1.bf16.msra.mxu0 %v2175_v32  ;;  %2270 = vmatpush3.bf16.msra.mxu1 %v2269_v33  ;;  %v883_v32 = vld [vmem:[#allocation4 + $0x320] sm:$0xff]  ;;  %v2678_v33 = vadd.f32 %v2637_v16, %v107_v24  ;;  %v2205_v16 = vpack.c.bf16 %v889_v38, %v886_v37  ;;  %v2231_v24 = vpack.c.bf16 %v924_v23, %v921_v22  ;;  %v1319_v37 = vld [vmem:[%s3034_s8 + $0x150] sm:$0xff]  ;;  %v1320_v38 = vld [vmem:[%s3034_s8 + $0x158] sm:$0xff] }
 0x14e   :  { %2178 = vmatprep.subr.bf16.mxu0 %v2177_v35  ;;  %2271 = vmatprep.subr.bf16.mxu1 %v2469_v47  ;;  %v2201_v35 = vpack.c.bf16 %v883_v32, %v880_v31  ;;  %v2325_v29 = vpack.c.bf16 %v1312_v28, %v1311_v3  ;;  %v1314_v31 = vld [vmem:[%s3034_s8 + $0x128] sm:$0xff]  ;;  %v1283_v8 = vld [vmem:[%s3034_s8 + $0x30] sm:$0xff]  ;;  %v1289_v28 = vld [vmem:[%s3034_s8 + $0x60] sm:$0xff] }
 0x14f   :  { %v336_v39 = vmax.f32 %v2678_v33, 0.0  ;;  %v2328_v32 = vpack.c.bf16 %v1314_v31, %v1313_v30  ;;  %v1315_v33 = vld [vmem:[%s3034_s8 + $0x130] sm:$0xff]  ;;  %v1306_v3 = vld [vmem:[%s3034_s8 + $0xe8] sm:$0xff] }
 0x150   :  { %v1287_v23 = vld [vmem:[%s3034_s8 + $0x50] sm:$0xff] }
 0x151   :  { %2180 = vmatpush1.bf16.msra.mxu0 %v2179_v40  ;;  %2273 = vmatpush3.bf16.msra.mxu1 %v2272_v41  ;;  %v2203_v40 = vpack.c.bf16 %v882_v2, %v879_v36  ;;  %v885_v41 = vld [vmem:[#allocation4 + $0x330] sm:$0xff]  ;;  %v1318_v36 = vld [vmem:[%s3034_s8 + $0x148] sm:$0xff] }
 0x152   :  { %2182 = vmatprep.subr.bf16.mxu0 %v2181_v43  ;;  %2274 = vmatprep.subr.bf16.mxu1 %v2469_v47  ;;  %v892_v43 = vld [vmem:[#allocation4 + $0x368] sm:$0xff]  ;;  %v2207_v45 = vpack.c.bf16 %v888_v42, %v885_v41  ;;  %v1323_v42 = vld [vmem:[%s3034_s8 + $0x170] sm:$0xff] }
 0x153   :  { %v2209_v46 = vpack.c.bf16 %v895_v44, %v892_v43  ;;  %v1324_v43 = vld [vmem:[%s3034_s8 + $0x178] sm:$0xff] }
 0x154   :  { %v2343_v44 = vpack.c.bf16 %v1324_v43, %v1323_v42 }
 0x155   :  { %2184 = vmatpush1.bf16.msra.mxu0 %v2183_v54  ;;  %2276 = vmatpush3.bf16.msra.mxu1 %v2275_v15  ;;  %v898_v54 = vld [vmem:[#allocation4 + $0x398] sm:$0xff]  ;;  %v901_v15 = vld [vmem:[#allocation4 + $0x3b0] sm:$0xff] }
 0x156   :  { %2186 = vmatprep.subr.bf16.mxu0 %v2185_v56  ;;  %2277 = vmatprep.subr.bf16.mxu1 %v2469_v47  ;;  %v2213_v56 = vpack.c.bf16 %v901_v15, %v898_v54  ;;  %v1278_v54 = vld [vmem:[%s3034_s8 + $0x8] sm:$0xff] }
 0x157   :  { %v2291_v15 = vpack.c.bf16 %v1278_v54, %v1277_v53 }
 0x159   :  { %2188 = vmatpush1.bf16.msra.mxu0 %v2187_v63  ;;  %2279 = vmatpush3.bf16.msra.mxu1 %v2278_v1  ;;  %v906_v63 = vld [vmem:[#allocation4 + $0x3d8] sm:$0xff] }
 0x15a   :  { %2190 = vmatprep.subr.bf16.mxu0 %v2189_v5  ;;  %2280 = vmatprep.subr.bf16.mxu1 %v2469_v47  ;;  %v910_v1 = vld [vmem:[#allocation4 + $0x3f8] sm:$0xff]  ;;  %v2219_v5 = vpack.c.bf16 %v906_v63, %v903_v62  ;;  %v1281_v63 = vld [vmem:[%s3034_s8 + $0x20] sm:$0xff] }
 0x15b   :  { %v2221_v6 = vpack.c.bf16 %v913_v4, %v910_v1  ;;  %v1282_v1 = vld [vmem:[%s3034_s8 + $0x28] sm:$0xff] }
 0x15c   :  { %v2299_v4 = vpack.c.bf16 %v1282_v1, %v1281_v63  ;;  %v1263_v1 = vld [vmem:[%s3033_s7 + $0x110] sm:$0xff] }
 0x15d   :  { %2192 = vmatpush1.bf16.msra.mxu0 %v2191_v12  ;;  %2282 = vmatpush3.bf16.msra.mxu1 %v2281_v13  ;;  %v2225_v12 = vpack.c.bf16 %v919_v10, %v916_v9  ;;  %v915_v13 = vld [vmem:[#allocation4 + $0x420] sm:$0xff]  ;;  %v1284_v9 = vld [vmem:[%s3034_s8 + $0x38] sm:$0xff] }
 0x15e   :  { %2194 = vmatprep.subr.bf16.mxu0 %v2193_v18  ;;  %2283 = vmatprep.subr.bf16.mxu1 %v2469_v47  ;;  %v922_v18 = vld [vmem:[#allocation4 + $0x458] sm:$0xff]  ;;  %v2227_v20 = vpack.c.bf16 %v918_v17, %v915_v13  ;;  %v2303_v10 = vpack.c.bf16 %v1284_v9, %v1283_v8  ;;  %v1285_v17 = vld [vmem:[%s3034_s8 + $0x40] sm:$0xff]  ;;  %v1267_v8 = vld [vmem:[%s3033_s7 + $0x130] sm:$0xff] }
 0x15f   :  { %v2229_v21 = vpack.c.bf16 %v925_v19, %v922_v18  ;;  %v1286_v18 = vld [vmem:[%s3034_s8 + $0x48] sm:$0xff] }
 0x160   :  { %v2307_v19 = vpack.c.bf16 %v1286_v18, %v1285_v17  ;;  %v1272_v17 = vld [vmem:[%s3033_s7 + $0x158] sm:$0xff] }
 0x161   :  { %2196 = vmatpush1.bf16.msra.mxu0 %v2195_v25  ;;  %2285 = vmatpush3.bf16.msra.mxu1 %v2284_v49  ;;  %v1309_v25 = vld [vmem:[%s3034_s8 + $0x100] sm:$0xff]  ;;  %v1310_v49 = vld [vmem:[%s3034_s8 + $0x108] sm:$0xff] }
 0x162   :  { %2198 = vmatprep.subr.bf16.mxu0 %v2197_v27  ;;  %2286 = vmatprep.subr.bf16.mxu1 %v2469_v47  ;;  %v2322_v27 = vpack.c.bf16 %v1310_v49, %v1309_v25  ;;  %v1305_v49 = vld [vmem:[%s3034_s8 + $0xe0] sm:$0xff] }
 0x165   :  { %2200 = vmatpush1.bf16.msra.mxu0 %v2199_v51  ;;  %2288 = vmatpush3.bf16.msra.mxu1 %v2287_v34  ;;  %v1316_v51 = vld [vmem:[%s3034_s8 + $0x138] sm:$0xff] }
 0x166   :  { %2202 = vmatprep.subr.bf16.mxu0 %v2201_v35  ;;  %v2331_v34 = vpack.c.bf16 %v1316_v51, %v1315_v33  ;;  %v1317_v35 = vld [vmem:[%s3034_s8 + $0x140] sm:$0xff]  ;;  %v1308_v33 = vld [vmem:[%s3034_s8 + $0xf8] sm:$0xff] }
 0x167   :  { %v2334_v2 = vpack.c.bf16 %v1318_v36, %v1317_v35  ;;  %v1291_v35 = vld [vmem:[%s3034_s8 + $0x70] sm:$0xff]  ;;  %v1292_v36 = vld [vmem:[%s3034_s8 + $0x78] sm:$0xff] }
 0x168   :  { %1009 = vmatmul.mubr.f32.vlgmr.msra.gmra.mrb[8].mxu0 %v334_v26  ;;  %1901 = vmatmul.mubr.f32.vlgmr.msra.gmra.mrb[6].mxu1 %v336_v39  ;;  %v904_v26 = vld [vmem:[#allocation4 + $0x3c8] sm:$0xff] }
 0x169   :  { %2204 = vmatpush1.bf16.msra.mxu0 %v2203_v40  ;;  %1079 = vmatprep.mubr.f32.mxu0 %v2468_v0  ;;  %v2217_v61 = vpack.c.bf16 %v907_v59, %v904_v26  ;;  %v1321_v40 = vld [vmem:[%s3034_s8 + $0x160] sm:$0xff]  ;;  %v1280_v26 = vld [vmem:[%s3034_s8 + $0x18] sm:$0xff] }
 0x16a   :  { %2206 = vmatprep.subr.bf16.mxu0 %v2205_v16  ;;  %v1322_v16 = vld [vmem:[%s3034_s8 + $0x168] sm:$0xff]  ;;  %v2295_v59 = vpack.c.bf16 %v1280_v26, %v1279_v14  ;;  %v1261_v14 = vld [vmem:[%s3033_s7 + $0x100] sm:$0xff] }
 0x16b   :  { %v2340_v41 = vpack.c.bf16 %v1322_v16, %v1321_v40  ;;  %v2853_v16 = vld [vmem:[%s3030_s4] sm:$0x7]  ;;  %v1262_v26 = vld [vmem:[%s3033_s7 + $0x108] sm:$0xff] }
 0x16d   :  { %2208 = vmatpush1.bf16.msra.mxu0 %v2207_v45  ;;  %v1293_v45 = vld [vmem:[%s3034_s8 + $0x80] sm:$0xff] }
 0x16e   :  { %2210 = vmatprep.subr.bf16.mxu0 %v2209_v46  ;;  %v1294_v46 = vld [vmem:[%s3034_s8 + $0x88] sm:$0xff] }
 0x16f   :  { %v2289_v48 = vpack.c.bf16 %v1294_v46, %v1293_v45 }
 0x171   :  { %2212 = vmatpush1.bf16.msra.mxu0 %v2211_v55  ;;  %2290 = vmatprep.subr.bf16.mxu1 %v2289_v48  ;;  %v1295_v55 = vld [vmem:[%s3034_s8 + $0x90] sm:$0xff] }
 0x172   :  { %2214 = vmatprep.subr.bf16.mxu0 %v2213_v56  ;;  %2292 = vmatpush3.bf16.msra.mxu1 %v2291_v15  ;;  %v1296_v56 = vld [vmem:[%s3034_s8 + $0x98] sm:$0xff] }
 0x173   :  { %v2293_v57 = vpack.c.bf16 %v1296_v56, %v1295_v55  ;;  %v927_v55 = vld [vmem:[%s3032_s6] sm:$0x7] }
 0x174   :  { %v940_v56 = vrot.slane %v927_v55, %v2647_v58 }
 0x175   :  { %2216 = vmatpush1.bf16.msra.mxu0 %v2215_v60  ;;  %2294 = vmatprep.subr.bf16.mxu1 %v2293_v57  ;;  %v1297_v60 = vld [vmem:[%s3034_s8 + $0xa0] sm:$0xff] }
 0x176   :  { %2218 = vmatprep.subr.bf16.mxu0 %v2217_v61  ;;  %2296 = vmatpush3.bf16.msra.mxu1 %v2295_v59  ;;  %v1298_v61 = vld [vmem:[%s3034_s8 + $0xa8] sm:$0xff] }
 0x177   :  { %v2297_v62 = vpack.c.bf16 %v1298_v61, %v1297_v60 }
 0x179   :  { %2220 = vmatpush1.bf16.msra.mxu0 %v2219_v5  ;;  %2298 = vmatprep.subr.bf16.mxu1 %v2297_v62  ;;  %v1299_v5 = vld [vmem:[%s3034_s8 + $0xb0] sm:$0xff]  ;;  %v2378_v62 = vpack.c.bf16 %v1262_v26, %v1261_v14  ;;  %v1254_v14 = vld [vmem:[%s3033_s7 + $0xc8] sm:$0xff] }
 0x17a   :  { %2222 = vmatprep.subr.bf16.mxu0 %v2221_v6  ;;  %2300 = vmatpush3.bf16.msra.mxu1 %v2299_v4  ;;  %v1300_v6 = vld [vmem:[%s3034_s8 + $0xb8] sm:$0xff] }
 0x17b   :  { %v2301_v7 = vpack.c.bf16 %v1300_v6, %v1299_v5  ;;  %v1265_v5 = vld [vmem:[%s3033_s7 + $0x120] sm:$0xff]  ;;  %v1266_v6 = vld [vmem:[%s3033_s7 + $0x128] sm:$0xff] }
 0x17d   :  { %2224 = vmatpush1.bf16.msra.mxu0 %v2223_v11  ;;  %2302 = vmatprep.subr.bf16.mxu1 %v2301_v7  ;;  %v1301_v11 = vld [vmem:[%s3034_s8 + $0xc0] sm:$0xff]  ;;  %v2384_v7 = vpack.c.bf16 %v1266_v6, %v1265_v5  ;;  %v1240_v5 = vld [vmem:[%s3033_s7 + $0x58] sm:$0xff] }
 0x17e   :  { %2226 = vmatprep.subr.bf16.mxu0 %v2225_v12  ;;  %2304 = vmatpush3.bf16.msra.mxu1 %v2303_v10  ;;  %v1302_v12 = vld [vmem:[%s3034_s8 + $0xc8] sm:$0xff]  ;;  %v1269_v10 = vld [vmem:[%s3033_s7 + $0x140] sm:$0xff] }
 0x17f   :  { %v2305_v13 = vpack.c.bf16 %v1302_v12, %v1301_v11  ;;  %v1270_v11 = vld [vmem:[%s3033_s7 + $0x148] sm:$0xff]  ;;  %v1257_v6 = vld [vmem:[%s3033_s7 + $0xe0] sm:$0xff] }
 0x180   :  { %v2390_v12 = vpack.c.bf16 %v1270_v11, %v1269_v10  ;;  %v1242_v10 = vld [vmem:[%s3033_s7 + $0x68] sm:$0xff]  ;;  %v1259_v11 = vld [vmem:[%s3033_s7 + $0xf0] sm:$0xff] }
 0x181   :  { %2228 = vmatpush1.bf16.msra.mxu0 %v2227_v20  ;;  %2306 = vmatprep.subr.bf16.mxu1 %v2305_v13  ;;  %v1303_v20 = vld [vmem:[%s3034_s8 + $0xd0] sm:$0xff] }
 0x182   :  { %2230 = vmatprep.subr.bf16.mxu0 %v2229_v21  ;;  %2308 = vmatpush3.bf16.msra.mxu1 %v2307_v19  ;;  %v1304_v21 = vld [vmem:[%s3034_s8 + $0xd8] sm:$0xff]  ;;  %v1271_v13 = vld [vmem:[%s3033_s7 + $0x150] sm:$0xff]  ;;  %v1273_v19 = vld [vmem:[%s3033_s7 + $0x160] sm:$0xff] }
 0x183   :  { %v2309_v22 = vpack.c.bf16 %v1304_v21, %v1303_v20  ;;  %v2393_v18 = vpack.c.bf16 %v1272_v17, %v1271_v13  ;;  %v1274_v20 = vld [vmem:[%s3033_s7 + $0x168] sm:$0xff]  ;;  %v486_v17 = vrot.slane %v2853_v16, %v2617_v50 }
 0x184   :  { %v2396_v21 = vpack.c.bf16 %v1274_v20, %v1273_v19  ;;  %v1243_v19 = vld [vmem:[%s3033_s7 + $0x70] sm:$0xff]  ;;  %v1244_v20 = vld [vmem:[%s3033_s7 + $0x78] sm:$0xff] }
 0x185   :  { %2232 = vmatpush1.bf16.msra.mxu0 %v2231_v24  ;;  %v1288_v24 = vld [vmem:[%s3034_s8 + $0x58] sm:$0xff]  ;;  %2310 = vmatprep.subr.bf16.mxu1 %v2309_v22  ;;  %v1275_v22 = vld [vmem:[%s3033_s7 + $0x170] sm:$0xff] }
 0x186   :  { %2321 = vmatprep.subr.bf16.mxu0 %v2469_v47  ;;  %v2311_v25 = vpack.c.bf16 %v1288_v24, %v1287_v23  ;;  %v1276_v23 = vld [vmem:[%s3033_s7 + $0x178] sm:$0xff]  ;;  %v932_v24 = vrot.slane %v927_v55, %v2617_v50 }
 0x188   :  { %1080 = vmatmul.mubr.f32.vlgmr.msra.gmra.mrb[8].mxu0 %v336_v39  ;;  %v2337_v39 = vpack.c.bf16 %v1320_v38, %v1319_v37  ;;  %2312 = vmatpush3.bf16.msra.mxu1 %v2311_v25  ;;  %v2319_v37 = vpack.c.bf16 %v1292_v36, %v1291_v35  ;;  %v1245_v38 = vld [vmem:[%s3033_s7 + $0x80] sm:$0xff]  ;;  %v490_v25 = vrot.slane %v2853_v16, %v2625_v52 }
 0x189   :  { %1935 = vmatprep.mubr.msk.f32.mxu0 %vm2470_vm1, %v2468_v0  ;;  %2323 = vmatpush3.bf16.msra.mxu0 %v2322_v27  ;;  %v2313_v27 = vpack.c.bf16 %v1306_v3, %v1305_v49  ;;  %v936_v49 = vrot.slane %v927_v55, %v2625_v52  ;;  %v2399_v3 = vpack.c.bf16 %v1276_v23, %v1275_v22  ;;  %v1247_v52 = vld [vmem:[%s3033_s7 + $0x90] sm:$0xff] }
 0x18a   :  { %2324 = vmatprep.subr.bf16.mxu0 %v2469_v47  ;;  %v1235_v55 = vld [vmem:[%s3033_s7 + $0x30] sm:$0xff] }
 0x18b   :  { %2314 = vmatprep.subr.bf16.mxu1 %v2313_v27 }
 0x18d   :  { %2326 = vmatpush3.bf16.msra.mxu0 %v2325_v29  ;;  %v1290_v29 = vld [vmem:[%s3034_s8 + $0x68] sm:$0xff] }
 0x18e   :  { %2327 = vmatprep.subr.bf16.mxu0 %v2469_v47  ;;  %v2315_v30 = vpack.c.bf16 %v1290_v29, %v1289_v28 }
 0x190   :  { %2316 = vmatpush3.bf16.msra.mxu1 %v2315_v30  ;;  %v1229_v30 = vld [vmem:[%s3033_s7] sm:$0xff] }
 0x191   :  { %2329 = vmatpush3.bf16.msra.mxu0 %v2328_v32  ;;  %v1307_v32 = vld [vmem:[%s3034_s8 + $0xf0] sm:$0xff] }
 0x192   :  { %2330 = vmatprep.subr.bf16.mxu0 %v2469_v47 }
 0x195   :  { %2332 = vmatpush3.bf16.msra.mxu0 %v2331_v34  ;;  %v2317_v34 = vpack.c.bf16 %v1308_v33, %v1307_v32 }
 0x196   :  { %2333 = vmatprep.subr.bf16.mxu0 %v2469_v47 }
 0x197   :  { %2318 = vmatprep.subr.bf16.mxu1 %v2317_v34 }
 0x198   :  { %2320 = vmatpush3.bf16.msra.mxu1 %v2319_v37  ;;  %v1231_v37 = vld [vmem:[%s3033_s7 + $0x10] sm:$0xff] }
 0x199   :  { %2335 = vmatpush3.bf16.msra.mxu0 %v2334_v2 }
 0x19a   :  { %2336 = vmatprep.subr.bf16.mxu0 %v2469_v47 }
 0x19d   :  { %2338 = vmatpush3.bf16.msra.mxu0 %v2337_v39  ;;  %v1246_v39 = vld [vmem:[%s3033_s7 + $0x88] sm:$0xff] }
 0x19e   :  { %2339 = vmatprep.subr.bf16.mxu0 %v2469_v47  ;;  %v2345_v40 = vpack.c.bf16 %v1246_v39, %v1245_v38  ;;  %v1232_v38 = vld [vmem:[%s3033_s7 + $0x18] sm:$0xff] }
 0x1a0   :  { %2346 = vmatprep.subr.bf16.mxu1 %v2345_v40  ;;  %v1249_v40 = vld [vmem:[%s3033_s7 + $0xa0] sm:$0xff] }
 0x1a1   :  { %2341 = vmatpush3.bf16.msra.mxu0 %v2340_v41  ;;  %v494_v41 = vrot.slane %v2853_v16, %v2647_v58  ;;  %v1264_v58 = vld [vmem:[%s3033_s7 + $0x118] sm:$0xff] }
 0x1a2   :  { %2342 = vmatprep.subr.bf16.mxu0 %v2469_v47  ;;  %v2381_v4 = vpack.c.bf16 %v1264_v58, %v1263_v1 }
 0x1a5   :  { %2344 = vmatpush3.bf16.msra.mxu0 %v2343_v44 }
 0x1a6   :  { %2377 = vmatprep.subr.bf16.mxu0 %v2469_v47 }
 0x1db   :  { %v1657_v31 = vpop.f32.mrb[4].mxu0 }
 0x1dc   :  { %v1658_v51 = vpop.f32.mrb[5].mxu0 }
 0x1dd   :  { %v1659_v2 = vadd.f32 %v1658_v51, %v1657_v31  ;;  %v1230_v31 = vld [vmem:[%s3033_s7 + $0x8] sm:$0xff] }
 0x1de   :  { %v2347_v35 = vpack.c.bf16 %v1230_v31, %v1229_v30 }
 0x1df   :  { %v707_v42 = vadd.f32 %v1659_v2, %v494_v41  ;;  %v1250_v41 = vld [vmem:[%s3033_s7 + $0xa8] sm:$0xff] }
 0x1fb   :  { %v2857_v43 = vpop.f32.mrb[2].mxu1  ;;  %v776_v44 = vpop.f32.mrb[6].mxu0 }
 0x1fc   :  { %v2859_v45 = vadd.f32 %v776_v44, %v707_v42  ;;  %v637_v46 = vpop.f32.mrb[3].mxu1  ;;  %v1867_v48 = vpop.f32.mrb[7].mxu0  ;;  %v2351_v42 = vpack.c.bf16 %v1232_v38, %v1231_v37  ;;  %v2353_v44 = vpack.c.bf16 %v1250_v41, %v1249_v40  ;;  %v2401_v22 = vadd.f32 %v2857_v43, %v486_v17  ;;  %v1624_v43 = vld [vmem:[%s3035_s9] ss:$0 sm:$0xff] }
 0x1fd   :  { %v2402_v32 = vadd.f32 %v637_v46, %v490_v25  ;;  %v1234_v46 = vld [vmem:[%s3033_s7 + $0x28] sm:$0xff]  ;;  %v1251_v48 = vld [vmem:[%s3033_s7 + $0xb0] sm:$0xff] }
 0x1fe   :  { %v782_v51 = vmax.f32 %v2859_v45, 0.0  ;;  %v1233_v45 = vld [vmem:[%s3033_s7 + $0x20] sm:$0xff]  ;;  %v780_v23 = vmax.f32 %v2401_v22, 0.0 }
 0x1ff   :  { %v781_v39 = vmax.f32 %v2402_v32, 0.0 }
 0x21b   :  { %v1709_v53 = vpop.f32.mrb[4].mxu1 }
 0x21c   :  { %v1710_v54 = vpop.f32.mrb[5].mxu1 }
 0x21d   :  { %v1711_v15 = vadd.f32 %v1710_v54, %v1709_v53  ;;  %v1252_v53 = vld [vmem:[%s3033_s7 + $0xb8] sm:$0xff]  ;;  %v2355_v54 = vpack.c.bf16 %v1234_v46, %v1233_v45 }
 0x21f   :  { %v1153_v57 = vadd.f32 %v1711_v15, %v940_v56  ;;  %v2357_v15 = vpack.c.bf16 %v1252_v53, %v1251_v48  ;;  %v1236_v56 = vld [vmem:[%s3033_s7 + $0x38] sm:$0xff] }
 0x220   :  { %v2359_v26 = vpack.c.bf16 %v1236_v56, %v1235_v55 }
 0x23b   :  { %v1222_v59 = vpop.f32.mrb[6].mxu1 }
 0x23c   :  { %v1223_v60 = vadd.f32 %v1222_v59, %v1153_v57  ;;  %v1902_v61 = vpop.f32.mrb[7].mxu1  ;;  %v1253_v57 = vld [vmem:[%s3033_s7 + $0xc0] sm:$0xff] }
 0x23d   :  { %v2361_v59 = vpack.c.bf16 %v1254_v14, %v1253_v57  ;;  %v1238_v61 = vld [vmem:[%s3033_s7 + $0x48] sm:$0xff] }
 0x23e   :  { %v1228_v63 = vmax.f32 %v1223_v60, 0.0  ;;  %v1237_v60 = vld [vmem:[%s3033_s7 + $0x40] sm:$0xff] }
 0x23f   :  { %v2363_v1 = vpack.c.bf16 %v1238_v61, %v1237_v60 }
 0x240   :  { %1936 = vmatmul.mubr.f32.vlgmr.msra.gmra.mrb[10].mxu0 %v1228_v63  ;;  %v1256_v63 = vld [vmem:[%s3033_s7 + $0xd8] sm:$0xff] }
 0x241   :  { %2379 = vmatpush3.bf16.msra.mxu0 %v2378_v62  ;;  %1970 = vmatprep.mubr.msk.f32.mxu0 %vm2470_vm1, %v2468_v0  ;;  %v1268_v0 = vld [vmem:[%s3033_s7 + $0x138] sm:$0xff]  ;;  %v1255_v62 = vld [vmem:[%s3033_s7 + $0xd0] sm:$0xff] }
 0x242   :  { %2380 = vmatprep.subr.bf16.mxu0 %v2469_v47  ;;  %v2387_v9 = vpack.c.bf16 %v1268_v0, %v1267_v8  ;;  %v2365_v58 = vpack.c.bf16 %v1256_v63, %v1255_v62 }
 0x245   :  { %2382 = vmatpush3.bf16.msra.mxu0 %v2381_v4  ;;  %v1239_v4 = vld [vmem:[%s3033_s7 + $0x50] sm:$0xff] }
 0x246   :  { %2383 = vmatprep.subr.bf16.mxu0 %v2469_v47  ;;  %v2367_v8 = vpack.c.bf16 %v1240_v5, %v1239_v4 }
 0x249   :  { %2385 = vmatpush3.bf16.msra.mxu0 %v2384_v7  ;;  %v1258_v7 = vld [vmem:[%s3033_s7 + $0xe8] sm:$0xff] }
 0x24a   :  { %2386 = vmatprep.subr.bf16.mxu0 %v2469_v47  ;;  %v2369_v0 = vpack.c.bf16 %v1258_v7, %v1257_v6 }
 0x24d   :  { %2388 = vmatpush3.bf16.msra.mxu0 %v2387_v9  ;;  %v1241_v9 = vld [vmem:[%s3033_s7 + $0x60] sm:$0xff] }
 0x24e   :  { %2389 = vmatprep.subr.bf16.mxu0 %v2469_v47  ;;  %v2371_v13 = vpack.c.bf16 %v1242_v10, %v1241_v9 }
 0x251   :  { %2391 = vmatpush3.bf16.msra.mxu0 %v2390_v12  ;;  %v1260_v12 = vld [vmem:[%s3033_s7 + $0xf8] sm:$0xff] }
 0x252   :  { %2392 = vmatprep.subr.bf16.mxu0 %v2469_v47 }
 0x255   :  { %2394 = vmatpush3.bf16.msra.mxu0 %v2393_v18  ;;  %v2373_v18 = vpack.c.bf16 %v1260_v12, %v1259_v11 }
 0x256   :  { %2395 = vmatprep.subr.bf16.mxu0 %v2469_v47 }
 0x259   :  { %2397 = vmatpush3.bf16.msra.mxu0 %v2396_v21  ;;  %v2375_v21 = vpack.c.bf16 %v1244_v20, %v1243_v19 }
 0x25a   :  { %2398 = vmatprep.subr.bf16.mxu0 %v2469_v47  ;;  %v1248_v47 = vld [vmem:[%s3033_s7 + $0x98] sm:$0xff] }
 0x25b   :  { %v1081_v27 = vpop.f32.mrb[8].mxu0  ;;  %v2349_v2 = vpack.c.bf16 %v1248_v47, %v1247_v52 }
 0x25c   :  { %v2403_v28 = vadd.f32 %v1081_v27, %v932_v24  ;;  %v1083_v29 = vpop.f32.mrb[9].mxu0 }
 0x25d   :  { %v2404_v33 = vadd.f32 %v1083_v29, %v936_v49  ;;  %2400 = vmatpush3.bf16.msra.mxu0 %v2399_v3 }
 0x25e   :  { %v1226_v36 = vmax.f32 %v2403_v28, 0.0 }
 0x25f   :  { %v1227_v34 = vmax.f32 %v2404_v33, 0.0 }
 0x260   :  { %1971 = vmatmul.mubr.f32.vlgmr.msra.gmra.mrb[12].mxu0 %v782_v51 }
 0x261   :  { %1389 = vmatprep.mubr.f32.mxu1 %v1227_v34 }
 0x262   :  { %1390 = vmatmul.mubr.f32.vlgmr.msra.gmra.mrb[8].mxu1 %v1226_v36 }
 0x263   :  { %2348 = vmatpush3.bf16.msra.mxu1 %v2347_v35  ;;  %1529 = vmatprep.mubr.f32.mxu1 %v781_v39 }
 0x264   :  { %2350 = vmatprep.subr.bf16.mxu1 %v2349_v2 }
 0x267   :  { %2352 = vmatpush3.bf16.msra.mxu1 %v2351_v42 }
 0x268   :  { %2354 = vmatprep.subr.bf16.mxu1 %v2353_v44 }
 0x26b   :  { %2356 = vmatpush3.bf16.msra.mxu1 %v2355_v54 }
 0x26c   :  { %2358 = vmatprep.subr.bf16.mxu1 %v2357_v15 }
 0x26f   :  { %2360 = vmatpush3.bf16.msra.mxu1 %v2359_v26 }
 0x270   :  { %2362 = vmatprep.subr.bf16.mxu1 %v2361_v59 }
 0x273   :  { %2364 = vmatpush3.bf16.msra.mxu1 %v2363_v1 }
 0x274   :  { %2366 = vmatprep.subr.bf16.mxu1 %v2365_v58 }
 0x277   :  { %2368 = vmatpush3.bf16.msra.mxu1 %v2367_v8 }
 0x278   :  { %2370 = vmatprep.subr.bf16.mxu1 %v2369_v0 }
 0x27b   :  { %2372 = vmatpush3.bf16.msra.mxu1 %v2371_v13 }
 0x27c   :  { %2374 = vmatprep.subr.bf16.mxu1 %v2373_v18 }
 0x27f   :  { %2376 = vmatpush3.bf16.msra.mxu1 %v2375_v21 }
 0x282   :  { %1530 = vmatmul.mubr.f32.vlgmr.msra.gmra.mrb[10].mxu1 %v780_v23 }
 0x313   :  { %v1461_v24 = vpop.f32.mrb[10].mxu0 }
 0x314   :  { %v1937_v50 = vpop.f32.mrb[11].mxu0 }
 0x333   :  { %v1601_v16 = vpop.f32.mrb[12].mxu0 }
 0x334   :  { %v1972_v25 = vpop.f32.mrb[13].mxu0 }
 0x335   :  { %v1761_v49 = vpop.f32.mrb[8].mxu1 }
 0x336   :  { %v1762_v3 = vpop.f32.mrb[9].mxu1 }
 0x337   :  { %v1763_v27 = vadd.f32 %v1762_v3, %v1761_v49 }
 0x339   :  { %v1462_v28 = vadd.f32 %v1763_v27, %v1461_v24 }
 0x355   :  { %v1813_v29 = vpop.f32.mrb[10].mxu1 }
 0x356   :  { %v1814_v30 = vpop.f32.mrb[11].mxu1 }
 0x357   :  { %v1815_v31 = vadd.f32 %v1814_v30, %v1813_v29 }
 0x359   :  { %v1532_v32 = vadd.f32 %v1815_v31, %v1462_v28 }
 0x35b   :  { %v1602_v33 = vadd.f32 %v1601_v16, %v1532_v32 }
 0x35d   :  { %v1612_v52 = vadd.f32 %v1624_v43, %v1602_v33 }
 0x35f   :  { %1614 = vst.msk [vmem:[%s3036_s10] sm:$0xff] %vm1613_vm2, %v1612_v52 }
 0x360   :  { %1619 = vsyncpa [#allocation3], 1 }
 0x361   :  { %1620 = vsyncpa [#allocation5], 1 }

</bundles_post_ra>
